<compile_context>
chip_gen: v7x
topology: tpu7x:2x2x1
jax: 0.10.0
libtpu: 0.0.40
codegen_flags: <defaults>
</compile_context>

<pallas_src>
from functools import partial

import numpy as np
import jax
import jax.numpy as jnp
from jax.experimental import pallas as pl
from jax.experimental.pallas import tpu as pltpu


MSSSIM_WEIGHTS = np.array([0.0448, 0.2856, 0.3001, 0.2363, 0.1333], dtype=np.float32)


# ------------------------- deterministic constant construction -------------------------
def _gaussian_1d(window_size: int, sigma: float) -> np.ndarray:
    x = np.arange(window_size, dtype=np.float64)
    g = np.exp(-((x - window_size // 2) ** 2) / (2.0 * sigma ** 2))
    return (g / g.sum()).astype(np.float32)


def _gauss_conv_matrices(h, w, window_size, sigma):
    """Separable 'valid' Gaussian conv as band matrices: blur(X) = Kh @ X @ Kw."""
    g = _gaussian_1d(window_size, sigma)
    hout = h - window_size + 1
    wout = w - window_size + 1
    kh = np.zeros((hout, h), dtype=np.float32)
    for i in range(hout):
        kh[i, i:i + window_size] = g
    kw = np.zeros((w, wout), dtype=np.float32)
    for j in range(wout):
        kw[j:j + window_size, j] = g
    return kh, kw


def _avg_pool_matrices(h, w):
    """2x2 / stride-2 average pooling as matrices: pool(X) = Ph @ X @ Pw."""
    hp, wp = h // 2, w // 2
    ph = np.zeros((hp, h), dtype=np.float32)
    pw = np.zeros((w, wp), dtype=np.float32)
    for i in range(hp):
        ph[i, 2 * i] = 0.5
        ph[i, 2 * i + 1] = 0.5
    for j in range(wp):
        pw[2 * j, j] = 0.5
        pw[2 * j + 1, j] = 0.5
    return ph, pw


# --------------------------------------- kernels ---------------------------------------
def _mm(a, b):
    return jnp.dot(a, b, preferred_element_type=jnp.float32)


def _fused_msssim_kernel(c1, c2, levels, x1_ref, x2_ref, *refs):
    """One (batch*channel) plane per grid step: all MS-SSIM levels fused.

    refs layout (after x1/x2): kh[levels], kw[levels], ph[levels-1], pw[levels-1],
    then outputs: ssim_sum[levels], cs_sum(last level), l1_sum(full res).
    """
    idx = 0
    kh_refs = refs[idx:idx + levels]; idx += levels
    kw_refs = refs[idx:idx + levels]; idx += levels
    ph_refs = refs[idx:idx + levels - 1]; idx += levels - 1
    pw_refs = refs[idx:idx + levels - 1]; idx += levels - 1
    ssim_refs = refs[idx:idx + levels]; idx += levels
    cs_ref = refs[idx]; idx += 1
    l1_ref = refs[idx]

    x1 = x1_ref[0]                       # (H, W) f32
    x2 = x2_ref[0]

    # L1 term (reference computes it on the full-resolution, cropped images only).
    l1_ref[0] = jnp.sum(jnp.abs(x1 - x2), keepdims=True)          # (1, 1)

    for lvl in range(levels):
        kh = kh_refs[lvl][...]           # (Hout, Hl)
        kw = kw_refs[lvl][...]           # (Wl, Wout)

        def blur(z, kh=kh, kw=kw):
            return _mm(_mm(kh, z), kw)

        mu1 = blur(x1)
        mu2 = blur(x2)
        mu1_sq = mu1 * mu1
        mu2_sq = mu2 * mu2
        mu1_mu2 = mu1 * mu2
        sigma1_sq = blur(x1 * x1) - mu1_sq
        sigma2_sq = blur(x2 * x2) - mu2_sq
        sigma12 = blur(x1 * x2) - mu1_mu2

        v1 = 2.0 * sigma12 + c2
        v2 = sigma1_sq + sigma2_sq + c2
        cs_map = v1 / v2
        ssim_map = ((2.0 * mu1_mu2 + c1) / (mu1_sq + mu2_sq + c1)) * cs_map

        ssim_refs[lvl][0] = jnp.sum(ssim_map, keepdims=True)      # (1, 1)

        if lvl == levels - 1:
            cs_ref[0] = jnp.sum(cs_map, keepdims=True)            # last level's CS only
        else:
            # 2x2 average pool feeding the next level, kept resident in VMEM.
            ph = ph_refs[lvl][...]       # (Hl//2, Hl)
            pw = pw_refs[lvl][...]       # (Wl, Wl//2)
            x1 = _mm(_mm(ph, x1), pw)
            x2 = _mm(_mm(ph, x2), pw)


def _l1_kernel(x1_ref, x2_ref, l1_ref):
    l1_ref[0] = jnp.sum(jnp.abs(x1_ref[0] - x2_ref[0]), keepdims=True)


# ---------------------------------- pallas_call wrappers --------------------------------
def _plane_spec(h, w):
    return pl.BlockSpec((1, h, w), lambda i: (i, 0, 0))


_SCALAR_SPEC = pl.BlockSpec((1, 1, 1), lambda i: (i, 0, 0))


def l1_msssim_sums_pallas(x1, x2, kh_list, kw_list, ph_list, pw_list, c1, c2):
    """x1/x2: (N, H, W) planes (N = B*C).  Returns per-plane partial sums:
    (ssim_sum_lvl0..lvlL-1, cs_sum_last, l1_sum), each of shape (N, 1, 1)."""
    n, h, w = x1.shape
    levels = len(kh_list)

    in_specs = [_plane_spec(h, w), _plane_spec(h, w)]
    consts = []
    for a in (*kh_list, *kw_list, *ph_list, *pw_list):
        in_specs.append(pl.BlockSpec(a.shape, lambda i: (0, 0)))
        consts.append(a)

    sum_shape = jax.ShapeDtypeStruct((n, 1, 1), jnp.float32)
    out_specs = tuple([_SCALAR_SPEC] * (levels + 2))
    out_shape = tuple([sum_shape] * (levels + 2))

    return pl.pallas_call(
        partial(_fused_msssim_kernel, c1, c2, levels),
        grid=(n,),
        in_specs=in_specs,
        out_specs=out_specs,
        out_shape=out_shape,
        compiler_params=pltpu.CompilerParams(dimension_semantics=("parallel",)),
    )(x1, x2, *consts)


def l1_sums_pallas(x1, x2):
    n, h, w = x1.shape
    return pl.pallas_call(
        _l1_kernel,
        grid=(n,),
        in_specs=[_plane_spec(h, w), _plane_spec(h, w)],
        out_specs=_SCALAR_SPEC,
        out_shape=jax.ShapeDtypeStruct((n, 1, 1), jnp.float32),
        compiler_params=pltpu.CompilerParams(dimension_semantics=("parallel",)),
    )(x1, x2)


# -------------------------------------- module port -------------------------------------
class L1andMSSSIMPallas:
    """Pallas port of L1andMSSSIM:  alpha * (1 - MS-SSIM) + beta * L1  (mean reductions)."""

    def __init__(self, img_range, alpha=0.84, beta=0.16, window_size=11, crop=True,
                 sigma=1.5, weights=MSSSIM_WEIGHTS):
        self.img_range = float(img_range)
        self.alpha = float(alpha)
        self.beta = float(beta)
        self.window_size = int(window_size)
        self.crop = crop
        self.sigma = float(sigma)
        self.weights_np = np.asarray(weights, dtype=np.float32)
        self.c1 = (0.01 * self.img_range) ** 2
        self.c2 = (0.03 * self.img_range) ** 2

    @staticmethod
    def _center_crop_align(img1, img2):
        # TODO(synk): torchvision CenterCrop pads when the target is larger; only the
        # crop-to-min-shape case (including identical shapes -> identity) is reproduced.
        h = min(img1.shape[2], img2.shape[2])
        w = min(img1.shape[3], img2.shape[3])

        def cc(x):
            top = (x.shape[2] - h) // 2
            left = (x.shape[3] - w) // 2
            return x[:, :, top:top + h, left:left + w]

        return cc(img1), cc(img2)

    def __call__(self, img1, img2):
        img1 = jnp.asarray(img1, jnp.float32)
        img2 = jnp.asarray(img2, jnp.float32)
        if self.crop:
            img1, img2 = self._center_crop_align(img1, img2)

        b, c, h, w = img1.shape
        n = b * c
        x1 = img1.reshape(n, h, w)
        x2 = img2.reshape(n, h, w)

        if self.alpha == 0:
            l1_sum = l1_sums_pallas(x1, x2)
            return self.beta * (jnp.sum(l1_sum) / float(n * h * w))

        levels = int(self.weights_np.shape[0])
        assert min(h, w) // (2 ** (levels - 1)) >= 2, (
            "spatial size too small for %d MS-SSIM levels "
            "(reference avg_pool2d would fail)" % levels)

        # Build the per-level band / pooling matrices (trace-time numpy constants).
        kh_list, kw_list, ph_list, pw_list, counts = [], [], [], [], []
        hl, wl = h, w
        for lvl in range(levels):
            ws = min(self.window_size, hl, wl)
            kh, kw = _gauss_conv_matrices(hl, wl, ws, self.sigma)
            kh_list.append(jnp.asarray(kh))
            kw_list.append(jnp.asarray(kw))
            counts.append(float(n * (hl - ws + 1) * (wl - ws + 1)))
            if lvl < levels - 1:
                ph, pw = _avg_pool_matrices(hl, wl)
                ph_list.append(jnp.asarray(ph))
                pw_list.append(jnp.asarray(pw))
                hl, wl = hl // 2, wl // 2

        outs = l1_msssim_sums_pallas(x1, x2, kh_list, kw_list, ph_list, pw_list,
                                     self.c1, self.c2)
        ssim_sums = outs[:levels]
        cs_sum = outs[levels]
        l1_sum = outs[levels + 1]

        ssim_means = jnp.stack([jnp.sum(s) / counts[i] for i, s in enumerate(ssim_sums)])
        cs_mean = jnp.sum(cs_sum) / counts[-1]
        l1_mean = jnp.sum(l1_sum) / float(n * h * w)

        weights = jnp.asarray(self.weights_np)
        ms_ssim = (cs_mean ** weights[-1]) * jnp.prod(ssim_means ** weights)
        return self.alpha * (1.0 - ms_ssim) + self.beta * l1_mean


if __name__ == "__main__":
    key = jax.random.PRNGKey(0)
    # spatial >= 32 so all 5 MS-SSIM levels (each followed by a 2x2 avg-pool) are valid,
    # exactly as the PyTorch reference requires.
    B, C, H, W = 2, 3, 32, 32
    k1, k2 = jax.random.split(key)
    img1 = jax.random.uniform(k1, (B, C, H, W), dtype=jnp.float32)
    noise = jax.random.uniform(k2, (B, C, H, W), dtype=jnp.float32)
    img2 = jnp.clip(img1 + 0.1 * (noise - 0.5), 0.0, 1.0)   # correlated pair (recon vs target)

    loss_fn = L1andMSSSIMPallas(img_range=1.0)
    out = loss_fn(img1, img2)
    jax.block_until_ready(out)
    print("KERNEL_OK")
</pallas_src>

<mosaic_0001>
module attributes {stable_mosaic.version = 11 : i64} {
  func.func @_fused_msssim_kernel(%arg0: i32, %arg1: memref<1x32x32xf32, #tpu.memory_space<vmem>>, %arg2: memref<1x32x32xf32, #tpu.memory_space<vmem>>, %arg3: memref<22x32xf32, #tpu.memory_space<vmem>>, %arg4: memref<6x16xf32, #tpu.memory_space<vmem>>, %arg5: memref<1x8xf32, #tpu.memory_space<vmem>>, %arg6: memref<1x4xf32, #tpu.memory_space<vmem>>, %arg7: memref<1x2xf32, #tpu.memory_space<vmem>>, %arg8: memref<32x22xf32, #tpu.memory_space<vmem>>, %arg9: memref<16x6xf32, #tpu.memory_space<vmem>>, %arg10: memref<8x1xf32, #tpu.memory_space<vmem>>, %arg11: memref<4x1xf32, #tpu.memory_space<vmem>>, %arg12: memref<2x1xf32, #tpu.memory_space<vmem>>, %arg13: memref<16x32xf32, #tpu.memory_space<vmem>>, %arg14: memref<8x16xf32, #tpu.memory_space<vmem>>, %arg15: memref<4x8xf32, #tpu.memory_space<vmem>>, %arg16: memref<2x4xf32, #tpu.memory_space<vmem>>, %arg17: memref<32x16xf32, #tpu.memory_space<vmem>>, %arg18: memref<16x8xf32, #tpu.memory_space<vmem>>, %arg19: memref<8x4xf32, #tpu.memory_space<vmem>>, %arg20: memref<4x2xf32, #tpu.memory_space<vmem>>, %arg21: memref<1x1x1xf32, #tpu.memory_space<vmem>>, %arg22: memref<1x1x1xf32, #tpu.memory_space<vmem>>, %arg23: memref<1x1x1xf32, #tpu.memory_space<vmem>>, %arg24: memref<1x1x1xf32, #tpu.memory_space<vmem>>, %arg25: memref<1x1x1xf32, #tpu.memory_space<vmem>>, %arg26: memref<1x1x1xf32, #tpu.memory_space<vmem>>, %arg27: memref<1x1x1xf32, #tpu.memory_space<vmem>>) attributes {dimension_semantics = [#tpu.dimension_semantics<parallel>], iteration_bounds = array<i64: 6>, scalar_prefetch = 0 : i64, scratch_operands = 0 : i64, tpu.core_type = #tpu.core_type<tc>, window_params = [{transform_indices = @transform_0, window_bounds = array<i64: 1, 32, 32>}, {transform_indices = @transform_1, window_bounds = array<i64: 1, 32, 32>}, {pipeline_mode = #tpu.pipeline_mode<synchronous>, transform_indices = @transform_2, window_bounds = array<i64: 22, 32>}, {pipeline_mode = #tpu.pipeline_mode<synchronous>, transform_indices = @transform_3, window_bounds = array<i64: 6, 16>}, {pipeline_mode = #tpu.pipeline_mode<synchronous>, transform_indices = @transform_4, window_bounds = array<i64: 1, 8>}, {pipeline_mode = #tpu.pipeline_mode<synchronous>, transform_indices = @transform_5, window_bounds = array<i64: 1, 4>}, {pipeline_mode = #tpu.pipeline_mode<synchronous>, transform_indices = @transform_6, window_bounds = array<i64: 1, 2>}, {pipeline_mode = #tpu.pipeline_mode<synchronous>, transform_indices = @transform_7, window_bounds = array<i64: 32, 22>}, {pipeline_mode = #tpu.pipeline_mode<synchronous>, transform_indices = @transform_8, window_bounds = array<i64: 16, 6>}, {pipeline_mode = #tpu.pipeline_mode<synchronous>, transform_indices = @transform_9, window_bounds = array<i64: 8, 1>}, {pipeline_mode = #tpu.pipeline_mode<synchronous>, transform_indices = @transform_10, window_bounds = array<i64: 4, 1>}, {pipeline_mode = #tpu.pipeline_mode<synchronous>, transform_indices = @transform_11, window_bounds = array<i64: 2, 1>}, {pipeline_mode = #tpu.pipeline_mode<synchronous>, transform_indices = @transform_12, window_bounds = array<i64: 16, 32>}, {pipeline_mode = #tpu.pipeline_mode<synchronous>, transform_indices = @transform_13, window_bounds = array<i64: 8, 16>}, {pipeline_mode = #tpu.pipeline_mode<synchronous>, transform_indices = @transform_14, window_bounds = array<i64: 4, 8>}, {pipeline_mode = #tpu.pipeline_mode<synchronous>, transform_indices = @transform_15, window_bounds = array<i64: 2, 4>}, {pipeline_mode = #tpu.pipeline_mode<synchronous>, transform_indices = @transform_16, window_bounds = array<i64: 32, 16>}, {pipeline_mode = #tpu.pipeline_mode<synchronous>, transform_indices = @transform_17, window_bounds = array<i64: 16, 8>}, {pipeline_mode = #tpu.pipeline_mode<synchronous>, transform_indices = @transform_18, window_bounds = array<i64: 8, 4>}, {pipeline_mode = #tpu.pipeline_mode<synchronous>, transform_indices = @transform_19, window_bounds = array<i64: 4, 2>}, {transform_indices = @transform_20, window_bounds = array<i64: 1, 1, 1>}, {transform_indices = @transform_21, window_bounds = array<i64: 1, 1, 1>}, {transform_indices = @transform_22, window_bounds = array<i64: 1, 1, 1>}, {transform_indices = @transform_23, window_bounds = array<i64: 1, 1, 1>}, {transform_indices = @transform_24, window_bounds = array<i64: 1, 1, 1>}, {transform_indices = @transform_25, window_bounds = array<i64: 1, 1, 1>}, {transform_indices = @transform_26, window_bounds = array<i64: 1, 1, 1>}]} {
    %c0 = arith.constant 0 : index
    %c0_0 = arith.constant 0 : index
    %c0_1 = arith.constant 0 : index
    %0 = vector.load %arg1[%c0, %c0_0, %c0_1] : memref<1x32x32xf32, #tpu.memory_space<vmem>>, vector<1x32x32xf32>
    %1 = vector.shape_cast %0 : vector<1x32x32xf32> to vector<32x32xf32>
    %c0_2 = arith.constant 0 : index
    %c0_3 = arith.constant 0 : index
    %c0_4 = arith.constant 0 : index
    %2 = vector.load %arg2[%c0_2, %c0_3, %c0_4] : memref<1x32x32xf32, #tpu.memory_space<vmem>>, vector<1x32x32xf32>
    %3 = vector.shape_cast %2 : vector<1x32x32xf32> to vector<32x32xf32>
    %4 = arith.subf %1, %3 : vector<32x32xf32>
    %5 = math.absf %4 : vector<32x32xf32>
    %6 = vector.shape_cast %5 : vector<32x32xf32> to vector<1x32x32xf32>
    %cst = arith.constant dense<0.000000e+00> : vector<1xf32>
    %7 = vector.multi_reduction <add>, %6, %cst [1, 2] : vector<1x32x32xf32> to vector<1xf32>
    %8 = vector.shape_cast %7 : vector<1xf32> to vector<1x1x1xf32>
    %9 = vector.extract %8[0, 0, 0] : f32 from vector<1x1x1xf32>
    %10 = vector.broadcast %9 : f32 to vector<1x1xf32>
    %c0_5 = arith.constant 0 : index
    %c0_6 = arith.constant 0 : index
    %c0_7 = arith.constant 0 : index
    %11 = vector.load %arg27[%c0_5, %c0_6, %c0_7] : memref<1x1x1xf32, #tpu.memory_space<vmem>>, vector<1x1x1xf32>
    %12 = vector.shape_cast %11 : vector<1x1x1xf32> to vector<1x1xf32>
    %13 = vector.shape_cast %10 : vector<1x1xf32> to vector<1x1x1xf32>
    tpu.vector_store %arg27[%c0_5, %c0_6, %c0_7], %13 {strides = array<i32>} : memref<1x1x1xf32, #tpu.memory_space<vmem>>, vector<1x1x1xf32>,
    %c0_8 = arith.constant 0 : index
    %c0_9 = arith.constant 0 : index
    %14 = vector.load %arg3[%c0_8, %c0_9] : memref<22x32xf32, #tpu.memory_space<vmem>>, vector<22x32xf32>
    %c0_10 = arith.constant 0 : index
    %c0_11 = arith.constant 0 : index
    %15 = vector.load %arg8[%c0_10, %c0_11] : memref<32x22xf32, #tpu.memory_space<vmem>>, vector<32x22xf32>
    %cst_12 = arith.constant dense<0.000000e+00> : vector<22x32xf32>
    %16 = tpu.matmul %14, %1, %cst_12 {dimension_numbers = #tpu.dot_dimension_numbers<[1], [0], [0], [1], [0, 0, 1, 1], [], []>} : vector<22x32xf32>, vector<32x32xf32>, vector<22x32xf32> -> vector<22x32xf32>
    %cst_13 = arith.constant dense<0.000000e+00> : vector<22x22xf32>
    %17 = tpu.matmul %16, %15, %cst_13 {dimension_numbers = #tpu.dot_dimension_numbers<[1], [0], [0], [1], [0, 0, 1, 1], [], []>} : vector<22x32xf32>, vector<32x22xf32>, vector<22x22xf32> -> vector<22x22xf32>
    %cst_14 = arith.constant dense<0.000000e+00> : vector<22x32xf32>
    %18 = tpu.matmul %14, %3, %cst_14 {dimension_numbers = #tpu.dot_dimension_numbers<[1], [0], [0], [1], [0, 0, 1, 1], [], []>} : vector<22x32xf32>, vector<32x32xf32>, vector<22x32xf32> -> vector<22x32xf32>
    %cst_15 = arith.constant dense<0.000000e+00> : vector<22x22xf32>
    %19 = tpu.matmul %18, %15, %cst_15 {dimension_numbers = #tpu.dot_dimension_numbers<[1], [0], [0], [1], [0, 0, 1, 1], [], []>} : vector<22x32xf32>, vector<32x22xf32>, vector<22x22xf32> -> vector<22x22xf32>
    %20 = arith.mulf %17, %17 : vector<22x22xf32>
    %21 = arith.mulf %19, %19 : vector<22x22xf32>
    %22 = arith.mulf %17, %19 : vector<22x22xf32>
    %23 = arith.mulf %1, %1 : vector<32x32xf32>
    %cst_16 = arith.constant dense<0.000000e+00> : vector<22x32xf32>
    %24 = tpu.matmul %14, %23, %cst_16 {dimension_numbers = #tpu.dot_dimension_numbers<[1], [0], [0], [1], [0, 0, 1, 1], [], []>} : vector<22x32xf32>, vector<32x32xf32>, vector<22x32xf32> -> vector<22x32xf32>
    %cst_17 = arith.constant dense<0.000000e+00> : vector<22x22xf32>
    %25 = tpu.matmul %24, %15, %cst_17 {dimension_numbers = #tpu.dot_dimension_numbers<[1], [0], [0], [1], [0, 0, 1, 1], [], []>} : vector<22x32xf32>, vector<32x22xf32>, vector<22x22xf32> -> vector<22x22xf32>
    %26 = arith.subf %25, %20 : vector<22x22xf32>
    %27 = arith.mulf %3, %3 : vector<32x32xf32>
    %cst_18 = arith.constant dense<0.000000e+00> : vector<22x32xf32>
    %28 = tpu.matmul %14, %27, %cst_18 {dimension_numbers = #tpu.dot_dimension_numbers<[1], [0], [0], [1], [0, 0, 1, 1], [], []>} : vector<22x32xf32>, vector<32x32xf32>, vector<22x32xf32> -> vector<22x32xf32>
    %cst_19 = arith.constant dense<0.000000e+00> : vector<22x22xf32>
    %29 = tpu.matmul %28, %15, %cst_19 {dimension_numbers = #tpu.dot_dimension_numbers<[1], [0], [0], [1], [0, 0, 1, 1], [], []>} : vector<22x32xf32>, vector<32x22xf32>, vector<22x22xf32> -> vector<22x22xf32>
    %30 = arith.subf %29, %21 : vector<22x22xf32>
    %31 = arith.mulf %1, %3 : vector<32x32xf32>
    %cst_20 = arith.constant dense<0.000000e+00> : vector<22x32xf32>
    %32 = tpu.matmul %14, %31, %cst_20 {dimension_numbers = #tpu.dot_dimension_numbers<[1], [0], [0], [1], [0, 0, 1, 1], [], []>} : vector<22x32xf32>, vector<32x32xf32>, vector<22x32xf32> -> vector<22x32xf32>
    %cst_21 = arith.constant dense<0.000000e+00> : vector<22x22xf32>
    %33 = tpu.matmul %32, %15, %cst_21 {dimension_numbers = #tpu.dot_dimension_numbers<[1], [0], [0], [1], [0, 0, 1, 1], [], []>} : vector<22x32xf32>, vector<32x22xf32>, vector<22x22xf32> -> vector<22x22xf32>
    %34 = arith.subf %33, %22 : vector<22x22xf32>
    %cst_22 = arith.constant 2.000000e+00 : f32
    %35 = vector.broadcast %cst_22 : f32 to vector<22x22xf32>
    %36 = arith.mulf %35, %34 : vector<22x22xf32>
    %cst_23 = arith.constant 8.99999984E-4 : f32
    %37 = vector.broadcast %cst_23 : f32 to vector<22x22xf32>
    %38 = arith.addf %36, %37 : vector<22x22xf32>
    %39 = arith.addf %26, %30 : vector<22x22xf32>
    %cst_24 = arith.constant 8.99999984E-4 : f32
    %40 = vector.broadcast %cst_24 : f32 to vector<22x22xf32>
    %41 = arith.addf %39, %40 : vector<22x22xf32>
    %42 = arith.divf %38, %41 : vector<22x22xf32>
    %cst_25 = arith.constant 2.000000e+00 : f32
    %43 = vector.broadcast %cst_25 : f32 to vector<22x22xf32>
    %44 = arith.mulf %43, %22 : vector<22x22xf32>
    %cst_26 = arith.constant 9.99999974E-5 : f32
    %45 = vector.broadcast %cst_26 : f32 to vector<22x22xf32>
    %46 = arith.addf %44, %45 : vector<22x22xf32>
    %47 = arith.addf %20, %21 : vector<22x22xf32>
    %cst_27 = arith.constant 9.99999974E-5 : f32
    %48 = vector.broadcast %cst_27 : f32 to vector<22x22xf32>
    %49 = arith.addf %47, %48 : vector<22x22xf32>
    %50 = arith.divf %46, %49 : vector<22x22xf32>
    %51 = arith.mulf %50, %42 : vector<22x22xf32>
    %52 = vector.shape_cast %51 : vector<22x22xf32> to vector<1x22x22xf32>
    %cst_28 = arith.constant dense<0.000000e+00> : vector<1xf32>
    %53 = vector.multi_reduction <add>, %52, %cst_28 [1, 2] : vector<1x22x22xf32> to vector<1xf32>
    %54 = vector.shape_cast %53 : vector<1xf32> to vector<1x1x1xf32>
    %55 = vector.extract %54[0, 0, 0] : f32 from vector<1x1x1xf32>
    %56 = vector.broadcast %55 : f32 to vector<1x1xf32>
    %c0_29 = arith.constant 0 : index
    %c0_30 = arith.constant 0 : index
    %c0_31 = arith.constant 0 : index
    %57 = vector.load %arg21[%c0_29, %c0_30, %c0_31] : memref<1x1x1xf32, #tpu.memory_space<vmem>>, vector<1x1x1xf32>
    %58 = vector.shape_cast %57 : vector<1x1x1xf32> to vector<1x1xf32>
    %59 = vector.shape_cast %56 : vector<1x1xf32> to vector<1x1x1xf32>
    tpu.vector_store %arg21[%c0_29, %c0_30, %c0_31], %59 {strides = array<i32>} : memref<1x1x1xf32, #tpu.memory_space<vmem>>, vector<1x1x1xf32>,
    %c0_32 = arith.constant 0 : index
    %c0_33 = arith.constant 0 : index
    %60 = vector.load %arg13[%c0_32, %c0_33] : memref<16x32xf32, #tpu.memory_space<vmem>>, vector<16x32xf32>
    %c0_34 = arith.constant 0 : index
    %c0_35 = arith.constant 0 : index
    %61 = vector.load %arg17[%c0_34, %c0_35] : memref<32x16xf32, #tpu.memory_space<vmem>>, vector<32x16xf32>
    %cst_36 = arith.constant dense<0.000000e+00> : vector<16x32xf32>
    %62 = tpu.matmul %60, %1, %cst_36 {dimension_numbers = #tpu.dot_dimension_numbers<[1], [0], [0], [1], [0, 0, 1, 1], [], []>} : vector<16x32xf32>, vector<32x32xf32>, vector<16x32xf32> -> vector<16x32xf32>
    %cst_37 = arith.constant dense<0.000000e+00> : vector<16x16xf32>
    %63 = tpu.matmul %62, %61, %cst_37 {dimension_numbers = #tpu.dot_dimension_numbers<[1], [0], [0], [1], [0, 0, 1, 1], [], []>} : vector<16x32xf32>, vector<32x16xf32>, vector<16x16xf32> -> vector<16x16xf32>
    %cst_38 = arith.constant dense<0.000000e+00> : vector<16x32xf32>
    %64 = tpu.matmul %60, %3, %cst_38 {dimension_numbers = #tpu.dot_dimension_numbers<[1], [0], [0], [1], [0, 0, 1, 1], [], []>} : vector<16x32xf32>, vector<32x32xf32>, vector<16x32xf32> -> vector<16x32xf32>
    %cst_39 = arith.constant dense<0.000000e+00> : vector<16x16xf32>
    %65 = tpu.matmul %64, %61, %cst_39 {dimension_numbers = #tpu.dot_dimension_numbers<[1], [0], [0], [1], [0, 0, 1, 1], [], []>} : vector<16x32xf32>, vector<32x16xf32>, vector<16x16xf32> -> vector<16x16xf32>
    %c0_40 = arith.constant 0 : index
    %c0_41 = arith.constant 0 : index
    %66 = vector.load %arg4[%c0_40, %c0_41] : memref<6x16xf32, #tpu.memory_space<vmem>>, vector<6x16xf32>
    %c0_42 = arith.constant 0 : index
    %c0_43 = arith.constant 0 : index
    %67 = vector.load %arg9[%c0_42, %c0_43] : memref<16x6xf32, #tpu.memory_space<vmem>>, vector<16x6xf32>
    %cst_44 = arith.constant dense<0.000000e+00> : vector<6x16xf32>
    %68 = tpu.matmul %66, %63, %cst_44 {dimension_numbers = #tpu.dot_dimension_numbers<[1], [0], [0], [1], [0, 0, 1, 1], [], []>} : vector<6x16xf32>, vector<16x16xf32>, vector<6x16xf32> -> vector<6x16xf32>
    %cst_45 = arith.constant dense<0.000000e+00> : vector<6x6xf32>
    %69 = tpu.matmul %68, %67, %cst_45 {dimension_numbers = #tpu.dot_dimension_numbers<[1], [0], [0], [1], [0, 0, 1, 1], [], []>} : vector<6x16xf32>, vector<16x6xf32>, vector<6x6xf32> -> vector<6x6xf32>
    %cst_46 = arith.constant dense<0.000000e+00> : vector<6x16xf32>
    %70 = tpu.matmul %66, %65, %cst_46 {dimension_numbers = #tpu.dot_dimension_numbers<[1], [0], [0], [1], [0, 0, 1, 1], [], []>} : vector<6x16xf32>, vector<16x16xf32>, vector<6x16xf32> -> vector<6x16xf32>
    %cst_47 = arith.constant dense<0.000000e+00> : vector<6x6xf32>
    %71 = tpu.matmul %70, %67, %cst_47 {dimension_numbers = #tpu.dot_dimension_numbers<[1], [0], [0], [1], [0, 0, 1, 1], [], []>} : vector<6x16xf32>, vector<16x6xf32>, vector<6x6xf32> -> vector<6x6xf32>
    %72 = arith.mulf %69, %69 : vector<6x6xf32>
    %73 = arith.mulf %71, %71 : vector<6x6xf32>
    %74 = arith.mulf %69, %71 : vector<6x6xf32>
    %75 = arith.mulf %63, %63 : vector<16x16xf32>
    %cst_48 = arith.constant dense<0.000000e+00> : vector<6x16xf32>
    %76 = tpu.matmul %66, %75, %cst_48 {dimension_numbers = #tpu.dot_dimension_numbers<[1], [0], [0], [1], [0, 0, 1, 1], [], []>} : vector<6x16xf32>, vector<16x16xf32>, vector<6x16xf32> -> vector<6x16xf32>
    %cst_49 = arith.constant dense<0.000000e+00> : vector<6x6xf32>
    %77 = tpu.matmul %76, %67, %cst_49 {dimension_numbers = #tpu.dot_dimension_numbers<[1], [0], [0], [1], [0, 0, 1, 1], [], []>} : vector<6x16xf32>, vector<16x6xf32>, vector<6x6xf32> -> vector<6x6xf32>
    %78 = arith.subf %77, %72 : vector<6x6xf32>
    %79 = arith.mulf %65, %65 : vector<16x16xf32>
    %cst_50 = arith.constant dense<0.000000e+00> : vector<6x16xf32>
    %80 = tpu.matmul %66, %79, %cst_50 {dimension_numbers = #tpu.dot_dimension_numbers<[1], [0], [0], [1], [0, 0, 1, 1], [], []>} : vector<6x16xf32>, vector<16x16xf32>, vector<6x16xf32> -> vector<6x16xf32>
    %cst_51 = arith.constant dense<0.000000e+00> : vector<6x6xf32>
    %81 = tpu.matmul %80, %67, %cst_51 {dimension_numbers = #tpu.dot_dimension_numbers<[1], [0], [0], [1], [0, 0, 1, 1], [], []>} : vector<6x16xf32>, vector<16x6xf32>, vector<6x6xf32> -> vector<6x6xf32>
    %82 = arith.subf %81, %73 : vector<6x6xf32>
    %83 = arith.mulf %63, %65 : vector<16x16xf32>
    %cst_52 = arith.constant dense<0.000000e+00> : vector<6x16xf32>
    %84 = tpu.matmul %66, %83, %cst_52 {dimension_numbers = #tpu.dot_dimension_numbers<[1], [0], [0], [1], [0, 0, 1, 1], [], []>} : vector<6x16xf32>, vector<16x16xf32>, vector<6x16xf32> -> vector<6x16xf32>
    %cst_53 = arith.constant dense<0.000000e+00> : vector<6x6xf32>
    %85 = tpu.matmul %84, %67, %cst_53 {dimension_numbers = #tpu.dot_dimension_numbers<[1], [0], [0], [1], [0, 0, 1, 1], [], []>} : vector<6x16xf32>, vector<16x6xf32>, vector<6x6xf32> -> vector<6x6xf32>
    %86 = arith.subf %85, %74 : vector<6x6xf32>
    %cst_54 = arith.constant 2.000000e+00 : f32
    %87 = vector.broadcast %cst_54 : f32 to vector<6x6xf32>
    %88 = arith.mulf %87, %86 : vector<6x6xf32>
    %cst_55 = arith.constant 8.99999984E-4 : f32
    %89 = vector.broadcast %cst_55 : f32 to vector<6x6xf32>
    %90 = arith.addf %88, %89 : vector<6x6xf32>
    %91 = arith.addf %78, %82 : vector<6x6xf32>
    %cst_56 = arith.constant 8.99999984E-4 : f32
    %92 = vector.broadcast %cst_56 : f32 to vector<6x6xf32>
    %93 = arith.addf %91, %92 : vector<6x6xf32>
    %94 = arith.divf %90, %93 : vector<6x6xf32>
    %cst_57 = arith.constant 2.000000e+00 : f32
    %95 = vector.broadcast %cst_57 : f32 to vector<6x6xf32>
    %96 = arith.mulf %95, %74 : vector<6x6xf32>
    %cst_58 = arith.constant 9.99999974E-5 : f32
    %97 = vector.broadcast %cst_58 : f32 to vector<6x6xf32>
    %98 = arith.addf %96, %97 : vector<6x6xf32>
    %99 = arith.addf %72, %73 : vector<6x6xf32>
    %cst_59 = arith.constant 9.99999974E-5 : f32
    %100 = vector.broadcast %cst_59 : f32 to vector<6x6xf32>
    %101 = arith.addf %99, %100 : vector<6x6xf32>
    %102 = arith.divf %98, %101 : vector<6x6xf32>
    %103 = arith.mulf %102, %94 : vector<6x6xf32>
    %104 = vector.shape_cast %103 : vector<6x6xf32> to vector<1x6x6xf32>
    %cst_60 = arith.constant dense<0.000000e+00> : vector<1xf32>
    %105 = vector.multi_reduction <add>, %104, %cst_60 [1, 2] : vector<1x6x6xf32> to vector<1xf32>
    %106 = vector.shape_cast %105 : vector<1xf32> to vector<1x1x1xf32>
    %107 = vector.extract %106[0, 0, 0] : f32 from vector<1x1x1xf32>
    %108 = vector.broadcast %107 : f32 to vector<1x1xf32>
    %c0_61 = arith.constant 0 : index
    %c0_62 = arith.constant 0 : index
    %c0_63 = arith.constant 0 : index
    %109 = vector.load %arg22[%c0_61, %c0_62, %c0_63] : memref<1x1x1xf32, #tpu.memory_space<vmem>>, vector<1x1x1xf32>
    %110 = vector.shape_cast %109 : vector<1x1x1xf32> to vector<1x1xf32>
    %111 = vector.shape_cast %108 : vector<1x1xf32> to vector<1x1x1xf32>
    tpu.vector_store %arg22[%c0_61, %c0_62, %c0_63], %111 {strides = array<i32>} : memref<1x1x1xf32, #tpu.memory_space<vmem>>, vector<1x1x1xf32>,
    %c0_64 = arith.constant 0 : index
    %c0_65 = arith.constant 0 : index
    %112 = vector.load %arg14[%c0_64, %c0_65] : memref<8x16xf32, #tpu.memory_space<vmem>>, vector<8x16xf32>
    %c0_66 = arith.constant 0 : index
    %c0_67 = arith.constant 0 : index
    %113 = vector.load %arg18[%c0_66, %c0_67] : memref<16x8xf32, #tpu.memory_space<vmem>>, vector<16x8xf32>
    %cst_68 = arith.constant dense<0.000000e+00> : vector<8x16xf32>
    %114 = tpu.matmul %112, %63, %cst_68 {dimension_numbers = #tpu.dot_dimension_numbers<[1], [0], [0], [1], [0, 0, 1, 1], [], []>} : vector<8x16xf32>, vector<16x16xf32>, vector<8x16xf32> -> vector<8x16xf32>
    %cst_69 = arith.constant dense<0.000000e+00> : vector<8x8xf32>
    %115 = tpu.matmul %114, %113, %cst_69 {dimension_numbers = #tpu.dot_dimension_numbers<[1], [0], [0], [1], [0, 0, 1, 1], [], []>} : vector<8x16xf32>, vector<16x8xf32>, vector<8x8xf32> -> vector<8x8xf32>
    %cst_70 = arith.constant dense<0.000000e+00> : vector<8x16xf32>
    %116 = tpu.matmul %112, %65, %cst_70 {dimension_numbers = #tpu.dot_dimension_numbers<[1], [0], [0], [1], [0, 0, 1, 1], [], []>} : vector<8x16xf32>, vector<16x16xf32>, vector<8x16xf32> -> vector<8x16xf32>
    %cst_71 = arith.constant dense<0.000000e+00> : vector<8x8xf32>
    %117 = tpu.matmul %116, %113, %cst_71 {dimension_numbers = #tpu.dot_dimension_numbers<[1], [0], [0], [1], [0, 0, 1, 1], [], []>} : vector<8x16xf32>, vector<16x8xf32>, vector<8x8xf32> -> vector<8x8xf32>
    %c0_72 = arith.constant 0 : index
    %c0_73 = arith.constant 0 : index
    %118 = vector.load %arg5[%c0_72, %c0_73] : memref<1x8xf32, #tpu.memory_space<vmem>>, vector<1x8xf32>
    %c0_74 = arith.constant 0 : index
    %c0_75 = arith.constant 0 : index
    %119 = vector.load %arg10[%c0_74, %c0_75] : memref<8x1xf32, #tpu.memory_space<vmem>>, vector<8x1xf32>
    %cst_76 = arith.constant dense<0.000000e+00> : vector<1x8xf32>
    %120 = tpu.matmul %118, %115, %cst_76 {dimension_numbers = #tpu.dot_dimension_numbers<[1], [0], [0], [1], [0, 0, 1, 1], [], []>} : vector<1x8xf32>, vector<8x8xf32>, vector<1x8xf32> -> vector<1x8xf32>
    %cst_77 = arith.constant dense<0.000000e+00> : vector<1x1xf32>
    %121 = tpu.matmul %120, %119, %cst_77 {dimension_numbers = #tpu.dot_dimension_numbers<[1], [0], [0], [1], [0, 0, 1, 1], [], []>} : vector<1x8xf32>, vector<8x1xf32>, vector<1x1xf32> -> vector<1x1xf32>
    %cst_78 = arith.constant dense<0.000000e+00> : vector<1x8xf32>
    %122 = tpu.matmul %118, %117, %cst_78 {dimension_numbers = #tpu.dot_dimension_numbers<[1], [0], [0], [1], [0, 0, 1, 1], [], []>} : vector<1x8xf32>, vector<8x8xf32>, vector<1x8xf32> -> vector<1x8xf32>
    %cst_79 = arith.constant dense<0.000000e+00> : vector<1x1xf32>
    %123 = tpu.matmul %122, %119, %cst_79 {dimension_numbers = #tpu.dot_dimension_numbers<[1], [0], [0], [1], [0, 0, 1, 1], [], []>} : vector<1x8xf32>, vector<8x1xf32>, vector<1x1xf32> -> vector<1x1xf32>
    %124 = arith.mulf %121, %121 : vector<1x1xf32>
    %125 = arith.mulf %123, %123 : vector<1x1xf32>
    %126 = arith.mulf %121, %123 : vector<1x1xf32>
    %127 = arith.mulf %115, %115 : vector<8x8xf32>
    %cst_80 = arith.constant dense<0.000000e+00> : vector<1x8xf32>
    %128 = tpu.matmul %118, %127, %cst_80 {dimension_numbers = #tpu.dot_dimension_numbers<[1], [0], [0], [1], [0, 0, 1, 1], [], []>} : vector<1x8xf32>, vector<8x8xf32>, vector<1x8xf32> -> vector<1x8xf32>
    %cst_81 = arith.constant dense<0.000000e+00> : vector<1x1xf32>
    %129 = tpu.matmul %128, %119, %cst_81 {dimension_numbers = #tpu.dot_dimension_numbers<[1], [0], [0], [1], [0, 0, 1, 1], [], []>} : vector<1x8xf32>, vector<8x1xf32>, vector<1x1xf32> -> vector<1x1xf32>
    %130 = arith.subf %129, %124 : vector<1x1xf32>
    %131 = arith.mulf %117, %117 : vector<8x8xf32>
    %cst_82 = arith.constant dense<0.000000e+00> : vector<1x8xf32>
    %132 = tpu.matmul %118, %131, %cst_82 {dimension_numbers = #tpu.dot_dimension_numbers<[1], [0], [0], [1], [0, 0, 1, 1], [], []>} : vector<1x8xf32>, vector<8x8xf32>, vector<1x8xf32> -> vector<1x8xf32>
    %cst_83 = arith.constant dense<0.000000e+00> : vector<1x1xf32>
    %133 = tpu.matmul %132, %119, %cst_83 {dimension_numbers = #tpu.dot_dimension_numbers<[1], [0], [0], [1], [0, 0, 1, 1], [], []>} : vector<1x8xf32>, vector<8x1xf32>, vector<1x1xf32> -> vector<1x1xf32>
    %134 = arith.subf %133, %125 : vector<1x1xf32>
    %135 = arith.mulf %115, %117 : vector<8x8xf32>
    %cst_84 = arith.constant dense<0.000000e+00> : vector<1x8xf32>
    %136 = tpu.matmul %118, %135, %cst_84 {dimension_numbers = #tpu.dot_dimension_numbers<[1], [0], [0], [1], [0, 0, 1, 1], [], []>} : vector<1x8xf32>, vector<8x8xf32>, vector<1x8xf32> -> vector<1x8xf32>
    %cst_85 = arith.constant dense<0.000000e+00> : vector<1x1xf32>
    %137 = tpu.matmul %136, %119, %cst_85 {dimension_numbers = #tpu.dot_dimension_numbers<[1], [0], [0], [1], [0, 0, 1, 1], [], []>} : vector<1x8xf32>, vector<8x1xf32>, vector<1x1xf32> -> vector<1x1xf32>
    %138 = arith.subf %137, %126 : vector<1x1xf32>
    %cst_86 = arith.constant 2.000000e+00 : f32
    %139 = vector.broadcast %cst_86 : f32 to vector<1x1xf32>
    %140 = arith.mulf %139, %138 : vector<1x1xf32>
    %cst_87 = arith.constant 8.99999984E-4 : f32
    %141 = vector.broadcast %cst_87 : f32 to vector<1x1xf32>
    %142 = arith.addf %140, %141 : vector<1x1xf32>
    %143 = arith.addf %130, %134 : vector<1x1xf32>
    %cst_88 = arith.constant 8.99999984E-4 : f32
    %144 = vector.broadcast %cst_88 : f32 to vector<1x1xf32>
    %145 = arith.addf %143, %144 : vector<1x1xf32>
    %146 = arith.divf %142, %145 : vector<1x1xf32>
    %cst_89 = arith.constant 2.000000e+00 : f32
    %147 = vector.broadcast %cst_89 : f32 to vector<1x1xf32>
    %148 = arith.mulf %147, %126 : vector<1x1xf32>
    %cst_90 = arith.constant 9.99999974E-5 : f32
    %149 = vector.broadcast %cst_90 : f32 to vector<1x1xf32>
    %150 = arith.addf %148, %149 : vector<1x1xf32>
    %151 = arith.addf %124, %125 : vector<1x1xf32>
    %cst_91 = arith.constant 9.99999974E-5 : f32
    %152 = vector.broadcast %cst_91 : f32 to vector<1x1xf32>
    %153 = arith.addf %151, %152 : vector<1x1xf32>
    %154 = arith.divf %150, %153 : vector<1x1xf32>
    %155 = arith.mulf %154, %146 : vector<1x1xf32>
    %156 = vector.shape_cast %155 : vector<1x1xf32> to vector<1x1x1xf32>
    %cst_92 = arith.constant dense<0.000000e+00> : vector<1xf32>
    %157 = vector.multi_reduction <add>, %156, %cst_92 [1, 2] : vector<1x1x1xf32> to vector<1xf32>
    %158 = vector.shape_cast %157 : vector<1xf32> to vector<1x1x1xf32>
    %159 = vector.extract %158[0, 0, 0] : f32 from vector<1x1x1xf32>
    %160 = vector.broadcast %159 : f32 to vector<1x1xf32>
    %c0_93 = arith.constant 0 : index
    %c0_94 = arith.constant 0 : index
    %c0_95 = arith.constant 0 : index
    %161 = vector.load %arg23[%c0_93, %c0_94, %c0_95] : memref<1x1x1xf32, #tpu.memory_space<vmem>>, vector<1x1x1xf32>
    %162 = vector.shape_cast %161 : vector<1x1x1xf32> to vector<1x1xf32>
    %163 = vector.shape_cast %160 : vector<1x1xf32> to vector<1x1x1xf32>
    tpu.vector_store %arg23[%c0_93, %c0_94, %c0_95], %163 {strides = array<i32>} : memref<1x1x1xf32, #tpu.memory_space<vmem>>, vector<1x1x1xf32>,
    %c0_96 = arith.constant 0 : index
    %c0_97 = arith.constant 0 : index
    %164 = vector.load %arg15[%c0_96, %c0_97] : memref<4x8xf32, #tpu.memory_space<vmem>>, vector<4x8xf32>
    %c0_98 = arith.constant 0 : index
    %c0_99 = arith.constant 0 : index
    %165 = vector.load %arg19[%c0_98, %c0_99] : memref<8x4xf32, #tpu.memory_space<vmem>>, vector<8x4xf32>
    %cst_100 = arith.constant dense<0.000000e+00> : vector<4x8xf32>
    %166 = tpu.matmul %164, %115, %cst_100 {dimension_numbers = #tpu.dot_dimension_numbers<[1], [0], [0], [1], [0, 0, 1, 1], [], []>} : vector<4x8xf32>, vector<8x8xf32>, vector<4x8xf32> -> vector<4x8xf32>
    %cst_101 = arith.constant dense<0.000000e+00> : vector<4x4xf32>
    %167 = tpu.matmul %166, %165, %cst_101 {dimension_numbers = #tpu.dot_dimension_numbers<[1], [0], [0], [1], [0, 0, 1, 1], [], []>} : vector<4x8xf32>, vector<8x4xf32>, vector<4x4xf32> -> vector<4x4xf32>
    %cst_102 = arith.constant dense<0.000000e+00> : vector<4x8xf32>
    %168 = tpu.matmul %164, %117, %cst_102 {dimension_numbers = #tpu.dot_dimension_numbers<[1], [0], [0], [1], [0, 0, 1, 1], [], []>} : vector<4x8xf32>, vector<8x8xf32>, vector<4x8xf32> -> vector<4x8xf32>
    %cst_103 = arith.constant dense<0.000000e+00> : vector<4x4xf32>
    %169 = tpu.matmul %168, %165, %cst_103 {dimension_numbers = #tpu.dot_dimension_numbers<[1], [0], [0], [1], [0, 0, 1, 1], [], []>} : vector<4x8xf32>, vector<8x4xf32>, vector<4x4xf32> -> vector<4x4xf32>
    %c0_104 = arith.constant 0 : index
    %c0_105 = arith.constant 0 : index
    %170 = vector.load %arg6[%c0_104, %c0_105] : memref<1x4xf32, #tpu.memory_space<vmem>>, vector<1x4xf32>
    %c0_106 = arith.constant 0 : index
    %c0_107 = arith.constant 0 : index
    %171 = vector.load %arg11[%c0_106, %c0_107] : memref<4x1xf32, #tpu.memory_space<vmem>>, vector<4x1xf32>
    %cst_108 = arith.constant dense<0.000000e+00> : vector<1x4xf32>
    %172 = tpu.matmul %170, %167, %cst_108 {dimension_numbers = #tpu.dot_dimension_numbers<[1], [0], [0], [1], [0, 0, 1, 1], [], []>} : vector<1x4xf32>, vector<4x4xf32>, vector<1x4xf32> -> vector<1x4xf32>
    %cst_109 = arith.constant dense<0.000000e+00> : vector<1x1xf32>
    %173 = tpu.matmul %172, %171, %cst_109 {dimension_numbers = #tpu.dot_dimension_numbers<[1], [0], [0], [1], [0, 0, 1, 1], [], []>} : vector<1x4xf32>, vector<4x1xf32>, vector<1x1xf32> -> vector<1x1xf32>
    %cst_110 = arith.constant dense<0.000000e+00> : vector<1x4xf32>
    %174 = tpu.matmul %170, %169, %cst_110 {dimension_numbers = #tpu.dot_dimension_numbers<[1], [0], [0], [1], [0, 0, 1, 1], [], []>} : vector<1x4xf32>, vector<4x4xf32>, vector<1x4xf32> -> vector<1x4xf32>
    %cst_111 = arith.constant dense<0.000000e+00> : vector<1x1xf32>
    %175 = tpu.matmul %174, %171, %cst_111 {dimension_numbers = #tpu.dot_dimension_numbers<[1], [0], [0], [1], [0, 0, 1, 1], [], []>} : vector<1x4xf32>, vector<4x1xf32>, vector<1x1xf32> -> vector<1x1xf32>
    %176 = arith.mulf %173, %173 : vector<1x1xf32>
    %177 = arith.mulf %175, %175 : vector<1x1xf32>
    %178 = arith.mulf %173, %175 : vector<1x1xf32>
    %179 = arith.mulf %167, %167 : vector<4x4xf32>
    %cst_112 = arith.constant dense<0.000000e+00> : vector<1x4xf32>
    %180 = tpu.matmul %170, %179, %cst_112 {dimension_numbers = #tpu.dot_dimension_numbers<[1], [0], [0], [1], [0, 0, 1, 1], [], []>} : vector<1x4xf32>, vector<4x4xf32>, vector<1x4xf32> -> vector<1x4xf32>
    %cst_113 = arith.constant dense<0.000000e+00> : vector<1x1xf32>
    %181 = tpu.matmul %180, %171, %cst_113 {dimension_numbers = #tpu.dot_dimension_numbers<[1], [0], [0], [1], [0, 0, 1, 1], [], []>} : vector<1x4xf32>, vector<4x1xf32>, vector<1x1xf32> -> vector<1x1xf32>
    %182 = arith.subf %181, %176 : vector<1x1xf32>
    %183 = arith.mulf %169, %169 : vector<4x4xf32>
    %cst_114 = arith.constant dense<0.000000e+00> : vector<1x4xf32>
    %184 = tpu.matmul %170, %183, %cst_114 {dimension_numbers = #tpu.dot_dimension_numbers<[1], [0], [0], [1], [0, 0, 1, 1], [], []>} : vector<1x4xf32>, vector<4x4xf32>, vector<1x4xf32> -> vector<1x4xf32>
    %cst_115 = arith.constant dense<0.000000e+00> : vector<1x1xf32>
    %185 = tpu.matmul %184, %171, %cst_115 {dimension_numbers = #tpu.dot_dimension_numbers<[1], [0], [0], [1], [0, 0, 1, 1], [], []>} : vector<1x4xf32>, vector<4x1xf32>, vector<1x1xf32> -> vector<1x1xf32>
    %186 = arith.subf %185, %177 : vector<1x1xf32>
    %187 = arith.mulf %167, %169 : vector<4x4xf32>
    %cst_116 = arith.constant dense<0.000000e+00> : vector<1x4xf32>
    %188 = tpu.matmul %170, %187, %cst_116 {dimension_numbers = #tpu.dot_dimension_numbers<[1], [0], [0], [1], [0, 0, 1, 1], [], []>} : vector<1x4xf32>, vector<4x4xf32>, vector<1x4xf32> -> vector<1x4xf32>
    %cst_117 = arith.constant dense<0.000000e+00> : vector<1x1xf32>
    %189 = tpu.matmul %188, %171, %cst_117 {dimension_numbers = #tpu.dot_dimension_numbers<[1], [0], [0], [1], [0, 0, 1, 1], [], []>} : vector<1x4xf32>, vector<4x1xf32>, vector<1x1xf32> -> vector<1x1xf32>
    %190 = arith.subf %189, %178 : vector<1x1xf32>
    %cst_118 = arith.constant 2.000000e+00 : f32
    %191 = vector.broadcast %cst_118 : f32 to vector<1x1xf32>
    %192 = arith.mulf %191, %190 : vector<1x1xf32>
    %cst_119 = arith.constant 8.99999984E-4 : f32
    %193 = vector.broadcast %cst_119 : f32 to vector<1x1xf32>
    %194 = arith.addf %192, %193 : vector<1x1xf32>
    %195 = arith.addf %182, %186 : vector<1x1xf32>
    %cst_120 = arith.constant 8.99999984E-4 : f32
    %196 = vector.broadcast %cst_120 : f32 to vector<1x1xf32>
    %197 = arith.addf %195, %196 : vector<1x1xf32>
    %198 = arith.divf %194, %197 : vector<1x1xf32>
    %cst_121 = arith.constant 2.000000e+00 : f32
    %199 = vector.broadcast %cst_121 : f32 to vector<1x1xf32>
    %200 = arith.mulf %199, %178 : vector<1x1xf32>
    %cst_122 = arith.constant 9.99999974E-5 : f32
    %201 = vector.broadcast %cst_122 : f32 to vector<1x1xf32>
    %202 = arith.addf %200, %201 : vector<1x1xf32>
    %203 = arith.addf %176, %177 : vector<1x1xf32>
    %cst_123 = arith.constant 9.99999974E-5 : f32
    %204 = vector.broadcast %cst_123 : f32 to vector<1x1xf32>
    %205 = arith.addf %203, %204 : vector<1x1xf32>
    %206 = arith.divf %202, %205 : vector<1x1xf32>
    %207 = arith.mulf %206, %198 : vector<1x1xf32>
    %208 = vector.shape_cast %207 : vector<1x1xf32> to vector<1x1x1xf32>
    %cst_124 = arith.constant dense<0.000000e+00> : vector<1xf32>
    %209 = vector.multi_reduction <add>, %208, %cst_124 [1, 2] : vector<1x1x1xf32> to vector<1xf32>
    %210 = vector.shape_cast %209 : vector<1xf32> to vector<1x1x1xf32>
    %211 = vector.extract %210[0, 0, 0] : f32 from vector<1x1x1xf32>
    %212 = vector.broadcast %211 : f32 to vector<1x1xf32>
    %c0_125 = arith.constant 0 : index
    %c0_126 = arith.constant 0 : index
    %c0_127 = arith.constant 0 : index
    %213 = vector.load %arg24[%c0_125, %c0_126, %c0_127] : memref<1x1x1xf32, #tpu.memory_space<vmem>>, vector<1x1x1xf32>
    %214 = vector.shape_cast %213 : vector<1x1x1xf32> to vector<1x1xf32>
    %215 = vector.shape_cast %212 : vector<1x1xf32> to vector<1x1x1xf32>
    tpu.vector_store %arg24[%c0_125, %c0_126, %c0_127], %215 {strides = array<i32>} : memref<1x1x1xf32, #tpu.memory_space<vmem>>, vector<1x1x1xf32>,
    %c0_128 = arith.constant 0 : index
    %c0_129 = arith.constant 0 : index
    %216 = vector.load %arg16[%c0_128, %c0_129] : memref<2x4xf32, #tpu.memory_space<vmem>>, vector<2x4xf32>
    %c0_130 = arith.constant 0 : index
    %c0_131 = arith.constant 0 : index
    %217 = vector.load %arg20[%c0_130, %c0_131] : memref<4x2xf32, #tpu.memory_space<vmem>>, vector<4x2xf32>
    %cst_132 = arith.constant dense<0.000000e+00> : vector<2x4xf32>
    %218 = tpu.matmul %216, %167, %cst_132 {dimension_numbers = #tpu.dot_dimension_numbers<[1], [0], [0], [1], [0, 0, 1, 1], [], []>} : vector<2x4xf32>, vector<4x4xf32>, vector<2x4xf32> -> vector<2x4xf32>
    %cst_133 = arith.constant dense<0.000000e+00> : vector<2x2xf32>
    %219 = tpu.matmul %218, %217, %cst_133 {dimension_numbers = #tpu.dot_dimension_numbers<[1], [0], [0], [1], [0, 0, 1, 1], [], []>} : vector<2x4xf32>, vector<4x2xf32>, vector<2x2xf32> -> vector<2x2xf32>
    %cst_134 = arith.constant dense<0.000000e+00> : vector<2x4xf32>
    %220 = tpu.matmul %216, %169, %cst_134 {dimension_numbers = #tpu.dot_dimension_numbers<[1], [0], [0], [1], [0, 0, 1, 1], [], []>} : vector<2x4xf32>, vector<4x4xf32>, vector<2x4xf32> -> vector<2x4xf32>
    %cst_135 = arith.constant dense<0.000000e+00> : vector<2x2xf32>
    %221 = tpu.matmul %220, %217, %cst_135 {dimension_numbers = #tpu.dot_dimension_numbers<[1], [0], [0], [1], [0, 0, 1, 1], [], []>} : vector<2x4xf32>, vector<4x2xf32>, vector<2x2xf32> -> vector<2x2xf32>
    %c0_136 = arith.constant 0 : index
    %c0_137 = arith.constant 0 : index
    %222 = vector.load %arg7[%c0_136, %c0_137] : memref<1x2xf32, #tpu.memory_space<vmem>>, vector<1x2xf32>
    %c0_138 = arith.constant 0 : index
    %c0_139 = arith.constant 0 : index
    %223 = vector.load %arg12[%c0_138, %c0_139] : memref<2x1xf32, #tpu.memory_space<vmem>>, vector<2x1xf32>
    %cst_140 = arith.constant dense<0.000000e+00> : vector<1x2xf32>
    %224 = tpu.matmul %222, %219, %cst_140 {dimension_numbers = #tpu.dot_dimension_numbers<[1], [0], [0], [1], [0, 0, 1, 1], [], []>} : vector<1x2xf32>, vector<2x2xf32>, vector<1x2xf32> -> vector<1x2xf32>
    %cst_141 = arith.constant dense<0.000000e+00> : vector<1x1xf32>
    %225 = tpu.matmul %224, %223, %cst_141 {dimension_numbers = #tpu.dot_dimension_numbers<[1], [0], [0], [1], [0, 0, 1, 1], [], []>} : vector<1x2xf32>, vector<2x1xf32>, vector<1x1xf32> -> vector<1x1xf32>
    %cst_142 = arith.constant dense<0.000000e+00> : vector<1x2xf32>
    %226 = tpu.matmul %222, %221, %cst_142 {dimension_numbers = #tpu.dot_dimension_numbers<[1], [0], [0], [1], [0, 0, 1, 1], [], []>} : vector<1x2xf32>, vector<2x2xf32>, vector<1x2xf32> -> vector<1x2xf32>
    %cst_143 = arith.constant dense<0.000000e+00> : vector<1x1xf32>
    %227 = tpu.matmul %226, %223, %cst_143 {dimension_numbers = #tpu.dot_dimension_numbers<[1], [0], [0], [1], [0, 0, 1, 1], [], []>} : vector<1x2xf32>, vector<2x1xf32>, vector<1x1xf32> -> vector<1x1xf32>
    %228 = arith.mulf %225, %225 : vector<1x1xf32>
    %229 = arith.mulf %227, %227 : vector<1x1xf32>
    %230 = arith.mulf %225, %227 : vector<1x1xf32>
    %231 = arith.mulf %219, %219 : vector<2x2xf32>
    %cst_144 = arith.constant dense<0.000000e+00> : vector<1x2xf32>
    %232 = tpu.matmul %222, %231, %cst_144 {dimension_numbers = #tpu.dot_dimension_numbers<[1], [0], [0], [1], [0, 0, 1, 1], [], []>} : vector<1x2xf32>, vector<2x2xf32>, vector<1x2xf32> -> vector<1x2xf32>
    %cst_145 = arith.constant dense<0.000000e+00> : vector<1x1xf32>
    %233 = tpu.matmul %232, %223, %cst_145 {dimension_numbers = #tpu.dot_dimension_numbers<[1], [0], [0], [1], [0, 0, 1, 1], [], []>} : vector<1x2xf32>, vector<2x1xf32>, vector<1x1xf32> -> vector<1x1xf32>
    %234 = arith.subf %233, %228 : vector<1x1xf32>
    %235 = arith.mulf %221, %221 : vector<2x2xf32>
    %cst_146 = arith.constant dense<0.000000e+00> : vector<1x2xf32>
    %236 = tpu.matmul %222, %235, %cst_146 {dimension_numbers = #tpu.dot_dimension_numbers<[1], [0], [0], [1], [0, 0, 1, 1], [], []>} : vector<1x2xf32>, vector<2x2xf32>, vector<1x2xf32> -> vector<1x2xf32>
    %cst_147 = arith.constant dense<0.000000e+00> : vector<1x1xf32>
    %237 = tpu.matmul %236, %223, %cst_147 {dimension_numbers = #tpu.dot_dimension_numbers<[1], [0], [0], [1], [0, 0, 1, 1], [], []>} : vector<1x2xf32>, vector<2x1xf32>, vector<1x1xf32> -> vector<1x1xf32>
    %238 = arith.subf %237, %229 : vector<1x1xf32>
    %239 = arith.mulf %219, %221 : vector<2x2xf32>
    %cst_148 = arith.constant dense<0.000000e+00> : vector<1x2xf32>
    %240 = tpu.matmul %222, %239, %cst_148 {dimension_numbers = #tpu.dot_dimension_numbers<[1], [0], [0], [1], [0, 0, 1, 1], [], []>} : vector<1x2xf32>, vector<2x2xf32>, vector<1x2xf32> -> vector<1x2xf32>
    %cst_149 = arith.constant dense<0.000000e+00> : vector<1x1xf32>
    %241 = tpu.matmul %240, %223, %cst_149 {dimension_numbers = #tpu.dot_dimension_numbers<[1], [0], [0], [1], [0, 0, 1, 1], [], []>} : vector<1x2xf32>, vector<2x1xf32>, vector<1x1xf32> -> vector<1x1xf32>
    %242 = arith.subf %241, %230 : vector<1x1xf32>
    %cst_150 = arith.constant 2.000000e+00 : f32
    %243 = vector.broadcast %cst_150 : f32 to vector<1x1xf32>
    %244 = arith.mulf %243, %242 : vector<1x1xf32>
    %cst_151 = arith.constant 8.99999984E-4 : f32
    %245 = vector.broadcast %cst_151 : f32 to vector<1x1xf32>
    %246 = arith.addf %244, %245 : vector<1x1xf32>
    %247 = arith.addf %234, %238 : vector<1x1xf32>
    %cst_152 = arith.constant 8.99999984E-4 : f32
    %248 = vector.broadcast %cst_152 : f32 to vector<1x1xf32>
    %249 = arith.addf %247, %248 : vector<1x1xf32>
    %250 = arith.divf %246, %249 : vector<1x1xf32>
    %cst_153 = arith.constant 2.000000e+00 : f32
    %251 = vector.broadcast %cst_153 : f32 to vector<1x1xf32>
    %252 = arith.mulf %251, %230 : vector<1x1xf32>
    %cst_154 = arith.constant 9.99999974E-5 : f32
    %253 = vector.broadcast %cst_154 : f32 to vector<1x1xf32>
    %254 = arith.addf %252, %253 : vector<1x1xf32>
    %255 = arith.addf %228, %229 : vector<1x1xf32>
    %cst_155 = arith.constant 9.99999974E-5 : f32
    %256 = vector.broadcast %cst_155 : f32 to vector<1x1xf32>
    %257 = arith.addf %255, %256 : vector<1x1xf32>
    %258 = arith.divf %254, %257 : vector<1x1xf32>
    %259 = arith.mulf %258, %250 : vector<1x1xf32>
    %260 = vector.shape_cast %259 : vector<1x1xf32> to vector<1x1x1xf32>
    %cst_156 = arith.constant dense<0.000000e+00> : vector<1xf32>
    %261 = vector.multi_reduction <add>, %260, %cst_156 [1, 2] : vector<1x1x1xf32> to vector<1xf32>
    %262 = vector.shape_cast %261 : vector<1xf32> to vector<1x1x1xf32>
    %263 = vector.extract %262[0, 0, 0] : f32 from vector<1x1x1xf32>
    %264 = vector.broadcast %263 : f32 to vector<1x1xf32>
    %c0_157 = arith.constant 0 : index
    %c0_158 = arith.constant 0 : index
    %c0_159 = arith.constant 0 : index
    %265 = vector.load %arg25[%c0_157, %c0_158, %c0_159] : memref<1x1x1xf32, #tpu.memory_space<vmem>>, vector<1x1x1xf32>
    %266 = vector.shape_cast %265 : vector<1x1x1xf32> to vector<1x1xf32>
    %267 = vector.shape_cast %264 : vector<1x1xf32> to vector<1x1x1xf32>
    tpu.vector_store %arg25[%c0_157, %c0_158, %c0_159], %267 {strides = array<i32>} : memref<1x1x1xf32, #tpu.memory_space<vmem>>, vector<1x1x1xf32>,
    %268 = vector.shape_cast %250 : vector<1x1xf32> to vector<1x1x1xf32>
    %cst_160 = arith.constant dense<0.000000e+00> : vector<1xf32>
    %269 = vector.multi_reduction <add>, %268, %cst_160 [1, 2] : vector<1x1x1xf32> to vector<1xf32>
    %270 = vector.shape_cast %269 : vector<1xf32> to vector<1x1x1xf32>
    %271 = vector.extract %270[0, 0, 0] : f32 from vector<1x1x1xf32>
    %272 = vector.broadcast %271 : f32 to vector<1x1xf32>
    %c0_161 = arith.constant 0 : index
    %c0_162 = arith.constant 0 : index
    %c0_163 = arith.constant 0 : index
    %273 = vector.load %arg26[%c0_161, %c0_162, %c0_163] : memref<1x1x1xf32, #tpu.memory_space<vmem>>, vector<1x1x1xf32>
    %274 = vector.shape_cast %273 : vector<1x1x1xf32> to vector<1x1xf32>
    %275 = vector.shape_cast %272 : vector<1x1xf32> to vector<1x1x1xf32>
    tpu.vector_store %arg26[%c0_161, %c0_162, %c0_163], %275 {strides = array<i32>} : memref<1x1x1xf32, #tpu.memory_space<vmem>>, vector<1x1x1xf32>,
    return
  }
  func.func @transform_0(%arg0: i32) -> (i32, i32, i32) {
    %c0_i32 = arith.constant 0 : i32
    %c0_i32_0 = arith.constant 0 : i32
    %c0_i32_1 = arith.constant 0 : i32
    return %arg0, %c0_i32, %c0_i32_0 : i32, i32, i32
  }
  func.func @transform_1(%arg0: i32) -> (i32, i32, i32) {
    %c0_i32 = arith.constant 0 : i32
    %c0_i32_0 = arith.constant 0 : i32
    %c0_i32_1 = arith.constant 0 : i32
    return %arg0, %c0_i32, %c0_i32_0 : i32, i32, i32
  }
  func.func @transform_2(%arg0: i32) -> (i32, i32) {
    %c0_i32 = arith.constant 0 : i32
    %c0_i32_0 = arith.constant 0 : i32
    %c0_i32_1 = arith.constant 0 : i32
    return %c0_i32, %c0_i32_0 : i32, i32
  }
  func.func @transform_3(%arg0: i32) -> (i32, i32) {
    %c0_i32 = arith.constant 0 : i32
    %c0_i32_0 = arith.constant 0 : i32
    %c0_i32_1 = arith.constant 0 : i32
    return %c0_i32, %c0_i32_0 : i32, i32
  }
  func.func @transform_4(%arg0: i32) -> (i32, i32) {
    %c0_i32 = arith.constant 0 : i32
    %c0_i32_0 = arith.constant 0 : i32
    %c0_i32_1 = arith.constant 0 : i32
    return %c0_i32, %c0_i32_0 : i32, i32
  }
  func.func @transform_5(%arg0: i32) -> (i32, i32) {
    %c0_i32 = arith.constant 0 : i32
    %c0_i32_0 = arith.constant 0 : i32
    %c0_i32_1 = arith.constant 0 : i32
    return %c0_i32, %c0_i32_0 : i32, i32
  }
  func.func @transform_6(%arg0: i32) -> (i32, i32) {
    %c0_i32 = arith.constant 0 : i32
    %c0_i32_0 = arith.constant 0 : i32
    %c0_i32_1 = arith.constant 0 : i32
    return %c0_i32, %c0_i32_0 : i32, i32
  }
  func.func @transform_7(%arg0: i32) -> (i32, i32) {
    %c0_i32 = arith.constant 0 : i32
    %c0_i32_0 = arith.constant 0 : i32
    %c0_i32_1 = arith.constant 0 : i32
    return %c0_i32, %c0_i32_0 : i32, i32
  }
  func.func @transform_8(%arg0: i32) -> (i32, i32) {
    %c0_i32 = arith.constant 0 : i32
    %c0_i32_0 = arith.constant 0 : i32
    %c0_i32_1 = arith.constant 0 : i32
    return %c0_i32, %c0_i32_0 : i32, i32
  }
  func.func @transform_9(%arg0: i32) -> (i32, i32) {
    %c0_i32 = arith.constant 0 : i32
    %c0_i32_0 = arith.constant 0 : i32
    %c0_i32_1 = arith.constant 0 : i32
    return %c0_i32, %c0_i32_0 : i32, i32
  }
  func.func @transform_10(%arg0: i32) -> (i32, i32) {
    %c0_i32 = arith.constant 0 : i32
    %c0_i32_0 = arith.constant 0 : i32
    %c0_i32_1 = arith.constant 0 : i32
    return %c0_i32, %c0_i32_0 : i32, i32
  }
  func.func @transform_11(%arg0: i32) -> (i32, i32) {
    %c0_i32 = arith.constant 0 : i32
    %c0_i32_0 = arith.constant 0 : i32
    %c0_i32_1 = arith.constant 0 : i32
    return %c0_i32, %c0_i32_0 : i32, i32
  }
  func.func @transform_12(%arg0: i32) -> (i32, i32) {
    %c0_i32 = arith.constant 0 : i32
    %c0_i32_0 = arith.constant 0 : i32
    %c0_i32_1 = arith.constant 0 : i32
    return %c0_i32, %c0_i32_0 : i32, i32
  }
  func.func @transform_13(%arg0: i32) -> (i32, i32) {
    %c0_i32 = arith.constant 0 : i32
    %c0_i32_0 = arith.constant 0 : i32
    %c0_i32_1 = arith.constant 0 : i32
    return %c0_i32, %c0_i32_0 : i32, i32
  }
  func.func @transform_14(%arg0: i32) -> (i32, i32) {
    %c0_i32 = arith.constant 0 : i32
    %c0_i32_0 = arith.constant 0 : i32
    %c0_i32_1 = arith.constant 0 : i32
    return %c0_i32, %c0_i32_0 : i32, i32
  }
  func.func @transform_15(%arg0: i32) -> (i32, i32) {
    %c0_i32 = arith.constant 0 : i32
    %c0_i32_0 = arith.constant 0 : i32
    %c0_i32_1 = arith.constant 0 : i32
    return %c0_i32, %c0_i32_0 : i32, i32
  }
  func.func @transform_16(%arg0: i32) -> (i32, i32) {
    %c0_i32 = arith.constant 0 : i32
    %c0_i32_0 = arith.constant 0 : i32
    %c0_i32_1 = arith.constant 0 : i32
    return %c0_i32, %c0_i32_0 : i32, i32
  }
  func.func @transform_17(%arg0: i32) -> (i32, i32) {
    %c0_i32 = arith.constant 0 : i32
    %c0_i32_0 = arith.constant 0 : i32
    %c0_i32_1 = arith.constant 0 : i32
    return %c0_i32, %c0_i32_0 : i32, i32
  }
  func.func @transform_18(%arg0: i32) -> (i32, i32) {
    %c0_i32 = arith.constant 0 : i32
    %c0_i32_0 = arith.constant 0 : i32
    %c0_i32_1 = arith.constant 0 : i32
    return %c0_i32, %c0_i32_0 : i32, i32
  }
  func.func @transform_19(%arg0: i32) -> (i32, i32) {
    %c0_i32 = arith.constant 0 : i32
    %c0_i32_0 = arith.constant 0 : i32
    %c0_i32_1 = arith.constant 0 : i32
    return %c0_i32, %c0_i32_0 : i32, i32
  }
  func.func @transform_20(%arg0: i32) -> (i32, i32, i32) {
    %c0_i32 = arith.constant 0 : i32
    %c0_i32_0 = arith.constant 0 : i32
    %c0_i32_1 = arith.constant 0 : i32
    return %arg0, %c0_i32, %c0_i32_0 : i32, i32, i32
  }
  func.func @transform_21(%arg0: i32) -> (i32, i32, i32) {
    %c0_i32 = arith.constant 0 : i32
    %c0_i32_0 = arith.constant 0 : i32
    %c0_i32_1 = arith.constant 0 : i32
    return %arg0, %c0_i32, %c0_i32_0 : i32, i32, i32
  }
  func.func @transform_22(%arg0: i32) -> (i32, i32, i32) {
    %c0_i32 = arith.constant 0 : i32
    %c0_i32_0 = arith.constant 0 : i32
    %c0_i32_1 = arith.constant 0 : i32
    return %arg0, %c0_i32, %c0_i32_0 : i32, i32, i32
  }
  func.func @transform_23(%arg0: i32) -> (i32, i32, i32) {
    %c0_i32 = arith.constant 0 : i32
    %c0_i32_0 = arith.constant 0 : i32
    %c0_i32_1 = arith.constant 0 : i32
    return %arg0, %c0_i32, %c0_i32_0 : i32, i32, i32
  }
  func.func @transform_24(%arg0: i32) -> (i32, i32, i32) {
    %c0_i32 = arith.constant 0 : i32
    %c0_i32_0 = arith.constant 0 : i32
    %c0_i32_1 = arith.constant 0 : i32
    return %arg0, %c0_i32, %c0_i32_0 : i32, i32, i32
  }
  func.func @transform_25(%arg0: i32) -> (i32, i32, i32) {
    %c0_i32 = arith.constant 0 : i32
    %c0_i32_0 = arith.constant 0 : i32
    %c0_i32_1 = arith.constant 0 : i32
    return %arg0, %c0_i32, %c0_i32_0 : i32, i32, i32
  }
  func.func @transform_26(%arg0: i32) -> (i32, i32, i32) {
    %c0_i32 = arith.constant 0 : i32
    %c0_i32_0 = arith.constant 0 : i32
    %c0_i32_1 = arith.constant 0 : i32
    return %arg0, %c0_i32, %c0_i32_0 : i32, i32, i32
  }
}

</mosaic_0001>

<bundles_post_ra>
// kernel: tpu_custom_call.1
= control target key start
LH: loop header
LB: loop body
LE: loop exit
PB: predicated region body
PF: predicated region fallthrough
CT: control target
= control target key end

     0   :  { %s8433_s0 = inlined_call_operand.hbm [shape: f32[6,32,32], index: 0, kind: input, shape index: {}]   ;;  %s8434_s1 = inlined_call_operand.hbm [shape: f32[6,32,32], index: 1, kind: input, shape index: {}]   ;;  %s8435_s2 = inlined_call_operand.vmem [shape: f32[22,32], index: 2, kind: input, shape index: {}]   ;;  %s8436_s3 = inlined_call_operand.vmem [shape: f32[6,16], index: 3, kind: input, shape index: {}]   ;;  %s8437_s4 = inlined_call_operand.vmem [shape: f32[1,8], index: 4, kind: input, shape index: {}]   ;;  %s8438_s5 = inlined_call_operand.vmem [shape: f32[1,4], index: 5, kind: input, shape index: {}]   ;;  %s8439_s6 = inlined_call_operand.vmem [shape: f32[1,2], index: 6, kind: input, shape index: {}]   ;;  %s8440_s7 = inlined_call_operand.vmem [shape: f32[32,22], index: 7, kind: input, shape index: {}]   ;;  %s8441_s8 = inlined_call_operand.vmem [shape: f32[16,6], index: 8, kind: input, shape index: {}]   ;;  %s8442_s9 = inlined_call_operand.vmem [shape: f32[8,1], index: 9, kind: input, shape index: {}]   ;;  %s8443_s10 = inlined_call_operand.vmem [shape: f32[4,1], index: 10, kind: input, shape index: {}]   ;;  %s8444_s11 = inlined_call_operand.vmem [shape: f32[2,1], index: 11, kind: input, shape index: {}]   ;;  %s8445_s12 = inlined_call_operand.vmem [shape: f32[16,32], index: 12, kind: input, shape index: {}]   ;;  %s8446_s13 = inlined_call_operand.vmem [shape: f32[8,16], index: 13, kind: input, shape index: {}]   ;;  %s8447_s14 = inlined_call_operand.vmem [shape: f32[4,8], index: 14, kind: input, shape index: {}]   ;;  %s8448_s15 = inlined_call_operand.vmem [shape: f32[2,4], index: 15, kind: input, shape index: {}]   ;;  %s8449_s16 = inlined_call_operand.vmem [shape: f32[32,16], index: 16, kind: input, shape index: {}]   ;;  %s8450_s17 = inlined_call_operand.vmem [shape: f32[16,8], index: 17, kind: input, shape index: {}]   ;;  %s8451_s18 = inlined_call_operand.vmem [shape: f32[8,4], index: 18, kind: input, shape index: {}]   ;;  %s8452_s19 = inlined_call_operand.vmem [shape: f32[4,2], index: 19, kind: input, shape index: {}]   ;;  %s8453_s20 = inlined_call_operand.vmem [shape: f32[6,1,1], index: 20, kind: output, shape index: {0}]   ;;  %s8454_s21 = inlined_call_operand.vmem [shape: f32[6,1,1], index: 21, kind: output, shape index: {1}]   ;;  %s8455_s22 = inlined_call_operand.vmem [shape: f32[6,1,1], index: 22, kind: output, shape index: {2}]   ;;  %s8456_s23 = inlined_call_operand.vmem [shape: f32[6,1,1], index: 23, kind: output, shape index: {3}]   ;;  %s8457_s24 = inlined_call_operand.vmem [shape: f32[6,1,1], index: 24, kind: output, shape index: {4}]   ;;  %s8458_s25 = inlined_call_operand.vmem [shape: f32[6,1,1], index: 25, kind: output, shape index: {5}]   ;;  %s8459_s26 = inlined_call_operand.vmem [shape: f32[6,1,1], index: 26, kind: output, shape index: {6}]  }
   0x1   :  { %8472 = sst [smem:[#allocation11_spill]] %s8433_s0 }
   0x2   :  { %8473 = sst [smem:[#allocation12_spill]] %s8434_s1 }
   0x3   :  { %8474 = sst [smem:[#allocation13_spill]] %s8435_s2 }
   0x4   :  { %8475 = sst [smem:[#allocation14_spill]] %s8436_s3 }
   0x5   :  { %8476 = sst [smem:[#allocation15_spill]] %s8437_s4 }
   0x6   :  { %8477 = sst [smem:[#allocation16_spill]] %s8438_s5 }
   0x7   :  { %8478 = sst [smem:[#allocation17_spill]] %s8439_s6 }
   0x8   :  { %8479 = sst [smem:[#allocation18_spill]] %s8440_s7 }
   0x9   :  { %8480 = sst [smem:[#allocation19_spill]] %s8441_s8 }
   0xa   :  { %8481 = sst [smem:[#allocation20_spill]] %s8442_s9 }
   0xb   :  { %8482 = sst [smem:[#allocation21_spill]] %s8443_s10 }
   0xc   :  { %8483 = sst [smem:[#allocation22_spill]] %s8444_s11 }
   0xd   :  { %8484 = sst [smem:[#allocation23_spill]] %s8452_s19 }
   0xe   :  { %8485 = sst [smem:[#allocation24_spill]] %s8456_s23 }
   0xf   :  { %8486 = sst [smem:[#allocation25_spill]] %s8457_s24 }
  0x10   :  { %8487 = sst [smem:[#allocation26_spill]] %s8458_s25 }
  0x11   :  { %32 = vsyncpa [#allocation3], 0 }
  0x12   :  { %34 = vsyncpa [#allocation3 + $0x1], 0 }
  0x13   :  { %35 = vsyncpa [#allocation5], 0 }
  0x14   :  { %37 = vsyncpa [#allocation5 + $0x1], 0  ;;  %s7668_s27 = smov 0   ;;  %s7670_s3 = smov 0  }
  0x15   :  { %s7672_s7 = smov 0   ;;  %s7674_s28 = smov 0  }
  0x16 LB: > { %8488 = sst [smem:[#allocation8_spill]] %s7520_s7  ;;  %s7687_s8 = sadd.s32 4294967295, %s7524_s28   ;;  %s7524_s28 = sphi %s7674_s28, %s8516_s28   ;;  %s7520_s7 = sphi %s7672_s7, %s8518_s7   ;;  %s7516_s3 = sphi %s7670_s3, %s8520_s3   ;;  %s7512_s27 = sphi %s7668_s27, %s8519_s27  }
  0x17   : > { %s7690_s4 = sadd.s32 1, %s7524_s28   ;;  %s50_s0 = sadd.s32 1, %s7520_s7 }
  0x18   : > { %8489 = sst [smem:[#allocation9_spill]] %s7690_s4  ;;  %s47_s29 = ssub.s32 %s7524_s28, %s7690_s4 }
  0x19   : > { %p48_p0 = scmp.eq.s32.totalorder %s47_s29, 0  ;;  %p57_p1 = scmp.ne.s32.totalorder %s7520_s7, %s7516_s3 }
  0x1a   : > { %p58_p2 = scmp.eq.s32.totalorder %s7524_s28, 0  ;;  %p63_p3 = scmp.ne.s32.totalorder %s7516_s3, %s7512_s27 }
  0x1b   : > { %s7700_s9 = scalar_select %p48_p0, %s7520_s7, %s50_s0  }
  0x1c   : > { %p59_p4 = por %p58_p2, %p57_p1  ;;  %p64_p5 = scmp.eq.s32.totalorder %s7687_s8, 0 }
  0x1d   : > { %8490 = sst [smem:[#allocation10_spill]] %s7700_s9  ;;  %p7360_p6 = scmp.lt.s32.totalorder %s7524_s28, 6 }
  0x1e   : > { %p7704_p7 = por %p64_p5, %p63_p3  ;;  %s7709_s2 = sand.u32 1, %s7520_s7  }
  0x1f   : > { %s8468_s5 = sshll.u32 %s7709_s2, 5  ;;  %s8469_s10 = sshll.u32 %s7524_s28, 9 }
  0x20   : > { %s8491_s30 = scalar_select %p7704_p7, 1, 0 }
  0x21   : > { %s8492_s27 = sld [smem:[#allocation11_spill]]  ;;  %s731_s9 = scalar_lea.vmem [#allocation2], %s8468_s5 }
  0x22   : > { %s738_s4 = sshll.u32 %s731_s9, 4  ;;  %p7724_p8 = pnand %p7360_p6, %p59_p4  ;;  %s7722_s4 = int_to_ptr.vmem [resolvable:$true] %s738_s4 }
  0x24   : > { %p7428_p11 = pneg %p7724_p8 }
  0x27   : > { %s8493_s29 = smov %s8492_s27  ;;  %s7718_s0 = scalar_lea.hbm %s8492_s27, %s8469_s10 }
  0x28   : > { %s7426_s6 = scalar_lea.hbm %s7718_s0, 512  ;;  %s7431_s27 = scalar_lea.hbm %s8493_s29, 3072 }
  0x29   : > { %p7427_p10 = scmp.ne.s32.totalorder %s7718_s0, %s7426_s6  ;;  %p7432_p0 = scmp.lt.u32.totalorder %s7718_s0, %s8493_s29 }
  0x2a   : > { %p7433_p1 = scmp.lt.u32.totalorder %s7431_s27, %s7426_s6  ;;  %p7435_p3 = scmp.lt.u32.totalorder %s7426_s6, %s7718_s0 }
  0x2b   : > { %p7429_p12 = pnand %p7428_p11, %p7427_p10 }
  0x2c   : > { %p7434_p2 = por %p7433_p1, %p7432_p0 }
  0x2d   : > { %p7430_p13 = pneg %p7429_p12 }
  0x2e   : > { %p7436_p4 = por %p7435_p3, %p7434_p2 }
  0x30   : > { %p7437_p5 = pnand %p7436_p4, %p7430_p13 }
  0x32   : > { %7440 = shalt.err (!%p7437_p5)
}
  0x33   : > { %s7441_s25 = scalar_lea.vmem %s7722_s4, 512  ;;  %s7526_s1 = smov [#allocation2]  }
  0x34   : > { %p7442_p6 = scmp.ne.s32.totalorder %s7722_s4, %s7441_s25  ;;  %s7446_s9 = sshll.u32 %s7526_s1, 4  ;;  %s7447_s9 = int_to_ptr.vmem [resolvable:$false] %s7446_s9 }
  0x35   : > { %s7448_s5 = scalar_lea.vmem %s7447_s9, 1024  ;;  %p7449_p9 = scmp.lt.s32.totalorder %s7722_s4, %s7447_s9 }
  0x36   : > { %p7444_p10 = pnand %p7442_p6, %p7428_p11  ;;  %p7450_p0 = scmp.lt.s32.totalorder %s7448_s5, %s7441_s25 }
  0x38   : > { %p7445_p12 = pneg %p7444_p10  ;;  %p7451_p1 = por %p7450_p0, %p7449_p9 }
  0x3a   : > { %p7452_p2 = pnand %p7451_p1, %p7445_p12 }
  0x3c   : > { %7455 = shalt.err (!%p7452_p2)
}
  0x3d   : > { %s7527_s10 = smov 128   ;;  %s7528_s6 = smov 8  }
  0x3e   : > { %s8495_s25 = scalar_lea.sflag [#allocation3], %s7709_s2  ;;  %p767_p9 = scmp.lt.s32.totalorder %s7524_s28, 7 }
  0x3f   : > { %7356 = dma.hbm_to_vmem [thread:$0]  (!%p7724_p8), %s7718_s0, 512, %s7722_s4, %s8495_s25, %s7527_s10, %s7527_s10, %s7528_s6  }
  0x40   : > { %s8496_s27 = sshll.u32 %s7524_s28, 9  ;;  %s8497_s5 = sld [smem:[#allocation12_spill]] }
  0x41   : > { %p8498_p13 = scmp.ge.s32.totalorder %s7524_s28, 1  ;;  %s8500_s11 = sshll.u32 %s7709_s2, 5 }
  0x42   : > { %s752_s23 = scalar_lea.vmem [#allocation4], %s8500_s11  ;;  %s749_s4 = scalar_lea.sflag [#allocation5], %s7709_s2 }
  0x43   : > { %p7770_p3 = pnand %p8498_p13, %p767_p9  ;;  %s759_s19 = sshll.u32 %s752_s23, 4  ;;  %s7776_s19 = int_to_ptr.vmem [resolvable:$true] %s759_s19 }
  0x46   : > { %s7766_s29 = scalar_lea.hbm %s8497_s5, %s8496_s27  ;;  %s7461_s27 = scalar_lea.hbm %s8497_s5, 3072 }
  0x47   : > { %s7456_s0 = scalar_lea.hbm %s7766_s29, 512  ;;  %p7462_p10 = scmp.lt.u32.totalorder %s7766_s29, %s8497_s5 }
  0x48   : > { %p7457_p4 = scmp.ne.s32.totalorder %s7766_s29, %s7456_s0  ;;  %p7463_p12 = scmp.lt.u32.totalorder %s7461_s27, %s7456_s0 }
  0x49   : > { %p7465_p1 = scmp.lt.u32.totalorder %s7456_s0, %s7766_s29 }
  0x4a   : > { %p7459_p5 = pnand %p7457_p4, %p7428_p11  ;;  %p7464_p0 = por %p7463_p12, %p7462_p10 }
  0x4c   : > { %p7460_p6 = pneg %p7459_p5  ;;  %p7466_p2 = por %p7465_p1, %p7464_p0 }
  0x4e   : > { %p7467_p9 = pnand %p7466_p2, %p7460_p6 }
  0x50   : > { %7470 = shalt.err (!%p7467_p9)
}
  0x51   : > { %s7471_s11 = scalar_lea.vmem %s7776_s19, 512  ;;  %s7529_s23 = smov [#allocation4]  }
  0x52   : > { %p7472_p13 = scmp.ne.s32.totalorder %s7776_s19, %s7471_s11  ;;  %s7476_s28 = sshll.u32 %s7529_s23, 4  ;;  %s7477_s28 = int_to_ptr.vmem [resolvable:$false] %s7476_s28 }
  0x53   : > { %s7478_s25 = scalar_lea.vmem %s7477_s28, 1024  ;;  %p7479_p7 = scmp.lt.s32.totalorder %s7776_s19, %s7477_s28 }
  0x54   : > { %p7474_p4 = pnand %p7472_p13, %p7428_p11  ;;  %p7480_p10 = scmp.lt.s32.totalorder %s7478_s25, %s7471_s11 }
  0x56   : > { %p7475_p5 = pneg %p7474_p4  ;;  %p7481_p12 = por %p7480_p10, %p7479_p7 }
  0x58   : > { %p7482_p0 = pnand %p7481_p12, %p7475_p5 }
  0x5a   : > { %7485 = shalt.err (!%p7482_p0)
}
  0x5b   : > { %7359 = dma.hbm_to_vmem [thread:$0]  (!%p7724_p8), %s7766_s29, 512, %s7776_s19, %s749_s4, %s7527_s10, %s7527_s10, %s7528_s6  }
  0x5c   : > { %771 = sbr.rel (%p7770_p3) target bundleno = 2453 (0x995), region = 100  ;;  %s773_s0 = sand.u32 (!%p7770_p3), 1, %s7516_s3  }
  0x5d   : > { %s6367_s27 = sshll.u32 (!%p7770_p3), %s773_s0, 5  ;;  %s774_s1 = scalar_lea.sflag (!%p7770_p3), [#allocation3], %s773_s0 }
  0x5e   : > { %s777_s9 = scalar_lea.vmem (!%p7770_p3), [#allocation2], %s6367_s27  ;;  %p8501_p7 = scmp.ne.s32.totalorder (!%p7770_p3), %s8491_s30, 0 }
  0x63   : > { %7503 = dma.done.wait (%p8501_p7), %s774_s1, 512  }
  0x64   : > { %7505 = vsyncadd (%p8501_p7), %s774_s1, 4294966784  ;;  %s783_s7 = scalar_lea.sflag [#allocation5], %s773_s0  ;;  %s7814_s2 = scalar_lea.vmem [#allocation4], %s6367_s27 }
  0x65   : > { %7507 = dma.done.wait (%p8501_p7), %s783_s7, 512  }
  0x66   : > { %7509 = vsyncadd (%p8501_p7), %s783_s7, 4294966784  ;;  %v7530_v0 = vmov 0.0|0.0   ;;  %vm7531_vm0 = vmmov 0   ;;  %v7532_v1 = vmov 0.0   ;;  %v7826_v2 = vld [vmem:[%s777_s9] sm:$0xff]  ;;  %v7828_v3 = vld [vmem:[%s777_s9 + $0x8] sm:$0xff] }
  0x67   : > { %7201 = vmatprep.subr.bf16.mxu0 %v7530_v0  ;;  %6707 = vmatprep.mubr.msk.f32.mxu0 %vm7531_vm0, %v7532_v1  ;;  %v7830_v4 = vld [vmem:[%s777_s9 + $0x10] sm:$0xff]  ;;  %v7834_v5 = vpack.c.bf16 %v7828_v3, %v7826_v2  ;;  %v7836_v6 = vld [vmem:[%s777_s9 + $0x18] sm:$0xff]  ;;  %v7844_v8 = vld [vmem:[%s7814_s2] sm:$0xff]  ;;  %s8502_s30 = sld [smem:[#allocation18_spill]]  ;;  %vm913_vm1 = vcmask 261120   ;;  %s8503_s0 = sld [smem:[#allocation13_spill]]  ;;  %v1296_v23 = vmul.f32 %v7826_v2, %v7826_v2  ;;  %v1297_v24 = vmul.f32 %v7828_v3, %v7828_v3 }
  0x68   : > { %7207 = vmatprep.subr.bf16.mxu1 %v7530_v0  ;;  %6724 = vmatprep.mubr.msk.f32.mxu1 %vm7531_vm0, %v7532_v1  ;;  %v7841_v7 = vpack.c.bf16 %v7836_v6, %v7830_v4  ;;  %v7848_v9 = vld [vmem:[%s7814_s2 + $0x8] sm:$0xff]  ;;  %v7876_v17 = vld [vmem:[%s7814_s2 + $0x10] sm:$0xff]  ;;  %v7879_v18 = vld [vmem:[%s7814_s2 + $0x18] sm:$0xff]  ;;  %v1298_v26 = vmul.f32 %v7830_v4, %v7830_v4  ;;  %v1299_v27 = vmul.f32 %v7836_v6, %v7836_v6  ;;  %vm1863_vm2 = vcmask 179200   ;;  %s8504_s7 = sld [smem:[#allocation14_spill]]  ;;  %p876_p8 = scmp.lt.s32.totalorder %s7687_s8, 5 }
  0x69   : > { %7203 = vmatpush3.bf16.msra.mxu0 %v7834_v5  ;;  %v7872_v16 = vpack.c.bf16 %v7848_v9, %v7844_v8  ;;  %v7897_v21 = vpack.c.bf16 %v7879_v18, %v7876_v17  ;;  %v7226_v25 = vpack.c.bf16 %v1297_v24, %v1296_v23  ;;  %v1472_v29 = vmul.f32 %v7844_v8, %v7844_v8  ;;  %v1881_v41 = vld [vmem:[%s8445_s12] sm:$0xff]  ;;  %v1882_v42 = vld [vmem:[%s8445_s12 + $0x8] sm:$0xff]  ;;  %s8505_s23 = sld [smem:[#allocation19_spill]]  ;;  %s8506_s4 = sld [smem:[#allocation15_spill]] }
  0x6a   : > { %7204 = vmatprep.subr.bf16.mxu0 %v7530_v0  ;;  %v7229_v28 = vpack.c.bf16 %v1299_v27, %v1298_v26  ;;  %v1473_v30 = vmul.f32 %v7848_v9, %v7848_v9  ;;  %v1474_v32 = vmul.f32 %v7876_v17, %v7876_v17  ;;  %v1475_v33 = vmul.f32 %v7879_v18, %v7879_v18  ;;  %v1883_v62 = vld [vmem:[%s8449_s16] sm:$0xff]  ;;  %v1884_v63 = vld [vmem:[%s8449_s16 + $0x8] sm:$0xff]  ;;  %s8522_s8 = smov (!%p876_p8, %s7687_s8), 5  ;;  %s8507_s1 = sld [smem:[#allocation20_spill]] }
  0x6b   : > { %v1648_v35 = vmul.f32 %v7844_v8, %v7826_v2  ;;  %v1649_v36 = vmul.f32 %v7848_v9, %v7828_v3  ;;  %v1650_v38 = vmul.f32 %v7876_v17, %v7830_v4  ;;  %v1651_v39 = vmul.f32 %v7879_v18, %v7836_v6  ;;  %s896_s10 = scalar_lea.vmem %s8459_s26, %s8522_s8  ;;  %s878_s9 = scalar_lea.vmem %s8453_s20, %s8522_s8 }
  0x6c   : > { %v7238_v31 = vpack.c.bf16 %v1473_v30, %v1472_v29  ;;  %v7241_v34 = vpack.c.bf16 %v1475_v33, %v1474_v32  ;;  %v905_v29 = vsub.f32 %v7826_v2, %v7844_v8  ;;  %v906_v30 = vsub.f32 %v7828_v3, %v7848_v9  ;;  %s881_s2 = scalar_lea.vmem %s8454_s21, %s8522_s8  ;;  %s8511_s11 = sld [smem:[#allocation17_spill]] }
  0x6d   : > { %v936_v10 = vld [vmem:[%s8502_s30] sm:$0xff]  ;;  %v937_v11 = vld [vmem:[%s8502_s30 + $0x8] sm:$0xff]  ;;  %v938_v12 = vld [vmem:[%s8502_s30 + $0x10] sm:$0xff]  ;;  %7206 = vmatpush3.bf16.msra.mxu0 %v7841_v7  ;;  %v7250_v37 = vpack.c.bf16 %v1649_v36, %v1648_v35  ;;  %v7253_v40 = vpack.c.bf16 %v1651_v39, %v1650_v38  ;;  %vm1867_vm3 = vcmask 177152   ;;  %vm2208_vm4 = vcmask 130048   ;;  %s8512_s27 = sld [smem:[#allocation24_spill]] }
  0x6e   : > { %v939_v13 = vld [vmem:[%s8502_s30 + $0x18] sm:$0xff]  ;;  %v7862_v14 = vpack.c.bf16 %v937_v11, %v936_v10  ;;  %v7868_v15 = vld [vmem:[%s8503_s0] sm:$0xff]  ;;  %7213 = vmatprep.subr.bf16.mxu0 %v7530_v0  ;;  %v7893_v20 = vld [vmem:[%s8503_s0 + $0x8] sm:$0xff]  ;;  %v909_v32 = vand.u32 2147483647, %v905_v29  ;;  %vm931_vm5 = vcmask 0  }
  0x6f   : > { %v7882_v19 = vpack.c.bf16 %v939_v13, %v938_v12  ;;  %v935_v22 = vld [vmem:[%s8503_s0 + $0x10] sm:$0x3f]  ;;  %v910_v33 = vand.u32 2147483647, %v906_v30  ;;  %vm3259_vm6 = vcmask 64512   ;;  %vm2952_vm7 = vcmask 46080  }
  0x70   : > { %7209 = vmatpush3.bf16.msra.mxu1 %v7862_v14  ;;  %6708 = vmatmul.mubr.msk.f32.vlgmr.msra.gmra.mrb[0].mxu0 %vm913_vm1, %v7868_v15  ;;  %v1885_v13 = vld [vmem:[%s8449_s16 + $0x10] sm:$0xff]  ;;  %v914_v36 = vsel %vm913_vm1, %v909_v32, 0.0  ;;  %vm4301_vm8 = vcmask 1043456   ;;  %vm4297_vm9 = vcmask 31744   ;;  %vm5361_vm10 = vcmask 1041408   ;;  %s8515_s25 = sld [smem:[#allocation26_spill]] }
  0x71   : > { %7210 = vmatprep.subr.bf16.mxu1 %v7530_v0  ;;  %6710 = vmatprep.mubr.msk.f32.mxu0 %vm7531_vm0, %v7532_v1  ;;  %vm5357_vm11 = vcmask 15360  }
  0x72   : > { %7215 = vmatpush3.bf16.msra.mxu0 %v7872_v16 }
  0x73   : > { %7216 = vmatprep.subr.bf16.mxu0 %v7530_v0 }
  0x74   : > { %7212 = vmatpush3.bf16.msra.mxu1 %v7882_v19  ;;  %6711 = vmatmul.mubr.msk.f32.gmra.mrb[2].mxu0 %vm913_vm1, %v7893_v20 }
  0x75   : > { %7219 = vmatprep.subr.bf16.mxu1 %v7530_v0  ;;  %6713 = vmatprep.mubr.msk.f32.mxu0 %vm7531_vm0, %v7532_v1 }
  0x76   : > { %7218 = vmatpush3.bf16.msra.mxu0 %v7897_v21 }
  0x77   : > { %7225 = vmatprep.subr.bf16.mxu0 %v7530_v0 }
  0x78   : > { %6714 = vmatmul.mubr.msk.f32.gmra.mrb[4].mxu0 %vm913_vm1, %v935_v22 }
  0x79   : > { %6741 = vmatprep.mubr.msk.f32.mxu0 %vm7531_vm0, %v7532_v1 }
  0x7c   : > { %6742 = vmatmul.mubr.msk.f32.vlgmr.msra.gmra.mrb[6].mxu0 %vm913_vm1, %v7868_v15 }
  0x7d   : > { %6744 = vmatprep.mubr.msk.f32.mxu0 %vm7531_vm0, %v7532_v1  ;;  %7227 = vmatpush3.bf16.msra.mxu0 %v7226_v25 }
  0x7e   : > { %7228 = vmatprep.subr.bf16.mxu0 %v7530_v0 }
  0x80   : > { %6745 = vmatmul.mubr.msk.f32.gmra.mrb[8].mxu0 %vm913_vm1, %v7893_v20 }
  0x81   : > { %6747 = vmatprep.mubr.msk.f32.mxu0 %vm7531_vm0, %v7532_v1  ;;  %7230 = vmatpush3.bf16.msra.mxu0 %v7229_v28 }
  0x82   : > { %7237 = vmatprep.subr.bf16.mxu0 %v7530_v0 }
  0x84   : > { %6748 = vmatmul.mubr.msk.f32.gmra.mrb[10].mxu0 %vm913_vm1, %v935_v22 }
  0x85   : > { %6775 = vmatprep.mubr.msk.f32.mxu0 %vm7531_vm0, %v7532_v1 }
  0x88   : > { %6776 = vmatmul.mubr.msk.f32.vlgmr.msra.gmra.mrb[12].mxu0 %vm913_vm1, %v7868_v15 }
  0x89   : > { %6778 = vmatprep.mubr.msk.f32.mxu0 %vm7531_vm0, %v7532_v1  ;;  %7239 = vmatpush3.bf16.msra.mxu0 %v7238_v31  ;;  %v907_v31 = vsub.f32 %v7830_v4, %v7876_v17 }
  0x8a   : > { %7240 = vmatprep.subr.bf16.mxu0 %v7530_v0 }
  0x8b   : > { %v911_v35 = vand.u32 2147483647, %v907_v31 }
  0x8c   : > { %6779 = vmatmul.mubr.msk.f32.gmra.mrb[14].mxu0 %vm913_vm1, %v7893_v20 }
  0x8d   : > { %6781 = vmatprep.mubr.msk.f32.mxu0 %vm7531_vm0, %v7532_v1  ;;  %7242 = vmatpush3.bf16.msra.mxu0 %v7241_v34  ;;  %v908_v34 = vsub.f32 %v7836_v6, %v7879_v18  ;;  %v917_v2 = vsel %vm913_vm1, %v911_v35, 0.0 }
  0x8e   : > { %7249 = vmatprep.subr.bf16.mxu0 %v7530_v0 }
  0x8f   : > { %v912_v39 = vand.u32 2147483647, %v908_v34 }
  0x90   : > { %6782 = vmatmul.mubr.msk.f32.gmra.mrb[16].mxu0 %vm913_vm1, %v935_v22 }
  0x91   : > { %6809 = vmatprep.mubr.msk.f32.mxu0 %vm7531_vm0, %v7532_v1  ;;  %v919_v3 = vsel %vm913_vm1, %v912_v39, 0.0 }
  0x94   : > { %6810 = vmatmul.mubr.msk.f32.vlgmr.msra.gmra.mrb[18].mxu0 %vm913_vm1, %v7868_v15 }
  0x95   : > { %6812 = vmatprep.mubr.msk.f32.mxu0 %vm7531_vm0, %v7532_v1  ;;  %7251 = vmatpush3.bf16.msra.mxu0 %v7250_v37  ;;  %v915_v37 = vsel %vm913_vm1, %v910_v33, 0.0 }
  0x96   : > { %7252 = vmatprep.subr.bf16.mxu0 %v7530_v0  ;;  %v916_v38 = vadd.f32 %v915_v37, %v914_v36 }
  0x98   : > { %6813 = vmatmul.mubr.msk.f32.gmra.mrb[20].mxu0 %vm913_vm1, %v7893_v20  ;;  %v918_v8 = vadd.f32 %v917_v2, %v916_v38 }
  0x99   : > { %6815 = vmatprep.mubr.msk.f32.mxu0 %vm7531_vm0, %v7532_v1  ;;  %7254 = vmatpush3.bf16.msra.mxu0 %v7253_v40 }
  0x9a   : > { %7262 = vmatprep.subr.bf16.mxu0 %v7834_v5  ;;  %v920_v9 = vadd.f32 %v919_v3, %v918_v8 }
  0x9c   : > { %6816 = vmatmul.mubr.msk.f32.gmra.mrb[22].mxu0 %vm913_vm1, %v935_v22  ;;  %921 = vadd.xlane.f32.xlu0 %v920_v9 }
  0x9d   : > { %6843 = vmatprep.mubr.msk.f32.mxu0 %vm7531_vm0, %v7532_v1 }
  0xa0   : > { %6844 = vmatmul.mubr.msk.f32.vlgmr.msra.gmra.mrb[24].mxu0 %vm913_vm1, %v7868_v15 }
  0xa1   : > { %6846 = vmatprep.mubr.msk.f32.mxu0 %vm7531_vm0, %v7532_v1  ;;  %7264 = vmatpush3.bf16.msra.mxu0 %v7834_v5 }
  0xa2   : > { %7266 = vmatprep.subr.bf16.mxu0 %v7841_v7 }
  0xa4   : > { %6847 = vmatmul.mubr.msk.f32.gmra.mrb[26].mxu0 %vm913_vm1, %v7893_v20 }
  0xa5   : > { %6849 = vmatprep.mubr.msk.f32.mxu0 %vm7531_vm0, %v7532_v1  ;;  %7268 = vmatpush3.bf16.msra.mxu0 %v7841_v7  ;;  %v7269_v7 = vpack.c.bf16 %v1884_v63, %v1883_v62 }
  0xa6   : > { %7278 = vmatprep.subr.bf16.mxu0 %v7872_v16 }
  0xa8   : > { %6850 = vmatmul.mubr.msk.f32.gmra.mrb[28].mxu0 %vm913_vm1, %v935_v22 }
  0xa9   : > { %6877 = vmatprep.mubr.msk.f32.mxu0 %vm913_vm1, %v1881_v41 }
  0xac   : > { %6878 = vmatmul.mubr.msk.f32.vlgmr.msra.gmra.mrb[30].mxu0 %vm913_vm1, %v1882_v42 }
  0xad   : > { %7280 = vmatpush3.bf16.msra.mxu0 %v7872_v16  ;;  %6899 = vmatprep.mubr.msk.f32.mxu0 %vm913_vm1, %v1881_v41 }
  0xae   : > { %7282 = vmatprep.subr.bf16.mxu0 %v7897_v21 }
  0xb1   : > { %7284 = vmatpush3.bf16.msra.mxu0 %v7897_v21 }
  0xb2   : > { %7293 = vmatprep.subr.bf16.mxu0 %v7530_v0 }
  0xb4   : > { %6900 = vmatmul.mubr.msk.f32.vlgmr.msra.gmra.mrb[32].mxu0 %vm913_vm1, %v1882_v42 }
  0xb5   : > { %6917 = vmatprep.mubr.msk.f32.mxu0 %vm7531_vm0, %v7532_v1 }
 0x143   : > { %v1015_v43 = vpop.f32.mrb[0].mxu0 }
 0x144   : > { %v6709_v44 = vpop.f32.mrb[1].mxu0  ;;  %6725 = vmatmul.mubr.msk.f32.vlgmr.msra.gmra.mrb[0].mxu1 %vm913_vm1, %v1015_v43 }
 0x145   : > { %6727 = vmatprep.mubr.msk.f32.mxu1 %vm7531_vm0, %v7532_v1  ;;  %7221 = vmatpush3.bf16.msra.mxu1 %v7862_v14 }
 0x146   : > { %7222 = vmatprep.subr.bf16.mxu1 %v7530_v0 }
 0x147   : > { %v1020_v45 = vpop.f32.mrb[2].mxu0 }
 0x148   : > { %v6712_v46 = vpop.f32.mrb[3].mxu0  ;;  %6728 = vmatmul.mubr.msk.f32.gmra.mrb[2].mxu1 %vm913_vm1, %v1020_v45 }
 0x149   : > { %6730 = vmatprep.mubr.msk.f32.mxu1 %vm7531_vm0, %v7532_v1  ;;  %7224 = vmatpush3.bf16.msra.mxu1 %v7882_v19 }
 0x14a   : > { %7231 = vmatprep.subr.bf16.mxu1 %v7530_v0 }
 0x14b   : > { %v1025_v47 = vpop.f32.mrb[4].mxu0 }
 0x14c   : > { %v6715_v48 = vpop.f32.mrb[5].mxu0  ;;  %6731 = vmatmul.mubr.msk.f32.gmra.mrb[4].mxu1 %vm913_vm1, %v1025_v47 }
 0x14d   : > { %6758 = vmatprep.mubr.msk.f32.mxu1 %vm7531_vm0, %v7532_v1 }
 0x14f   : > { %v1184_v49 = vpop.f32.mrb[6].mxu0 }
 0x150   : > { %v6743_v50 = vpop.f32.mrb[7].mxu0  ;;  %6759 = vmatmul.mubr.msk.f32.vlgmr.msra.gmra.mrb[6].mxu1 %vm913_vm1, %v1184_v49 }
 0x151   : > { %6761 = vmatprep.mubr.msk.f32.mxu1 %vm7531_vm0, %v7532_v1  ;;  %7233 = vmatpush3.bf16.msra.mxu1 %v7862_v14 }
 0x152   : > { %7234 = vmatprep.subr.bf16.mxu1 %v7530_v0 }
 0x153   : > { %v1189_v51 = vpop.f32.mrb[8].mxu0 }
 0x154   : > { %v6746_v52 = vpop.f32.mrb[9].mxu0  ;;  %6762 = vmatmul.mubr.msk.f32.gmra.mrb[8].mxu1 %vm913_vm1, %v1189_v51 }
 0x155   : > { %6764 = vmatprep.mubr.msk.f32.mxu1 %vm7531_vm0, %v7532_v1  ;;  %7236 = vmatpush3.bf16.msra.mxu1 %v7882_v19 }
 0x156   : > { %7243 = vmatprep.subr.bf16.mxu1 %v7530_v0 }
 0x157   : > { %v1194_v53 = vpop.f32.mrb[10].mxu0 }
 0x158   : > { %v6749_v54 = vpop.f32.mrb[11].mxu0  ;;  %6765 = vmatmul.mubr.msk.f32.gmra.mrb[10].mxu1 %vm913_vm1, %v1194_v53 }
 0x159   : > { %6792 = vmatprep.mubr.msk.f32.mxu1 %vm7531_vm0, %v7532_v1 }
 0x15b   : > { %v1366_v55 = vpop.f32.mrb[12].mxu0 }
 0x15c   : > { %v6777_v56 = vpop.f32.mrb[13].mxu0  ;;  %6793 = vmatmul.mubr.msk.f32.vlgmr.msra.gmra.mrb[12].mxu1 %vm913_vm1, %v1366_v55 }
 0x15d   : > { %6795 = vmatprep.mubr.msk.f32.mxu1 %vm7531_vm0, %v7532_v1  ;;  %7245 = vmatpush3.bf16.msra.mxu1 %v7862_v14 }
 0x15e   : > { %7246 = vmatprep.subr.bf16.mxu1 %v7530_v0 }
 0x15f   : > { %v1371_v57 = vpop.f32.mrb[14].mxu0 }
 0x160   : > { %v6780_v58 = vpop.f32.mrb[15].mxu0  ;;  %6796 = vmatmul.mubr.msk.f32.gmra.mrb[14].mxu1 %vm913_vm1, %v1371_v57 }
 0x161   : > { %6798 = vmatprep.mubr.msk.f32.mxu1 %vm7531_vm0, %v7532_v1  ;;  %7248 = vmatpush3.bf16.msra.mxu1 %v7882_v19 }
 0x162   : > { %7255 = vmatprep.subr.bf16.mxu1 %v7530_v0 }
 0x163   : > { %v1376_v59 = vpop.f32.mrb[16].mxu0 }
 0x164   : > { %v6783_v60 = vpop.f32.mrb[17].mxu0  ;;  %6799 = vmatmul.mubr.msk.f32.gmra.mrb[16].mxu1 %vm913_vm1, %v1376_v59 }
 0x165   : > { %6826 = vmatprep.mubr.msk.f32.mxu1 %vm7531_vm0, %v7532_v1 }
 0x167   : > { %v1542_v61 = vpop.f32.mrb[18].mxu0 }
 0x168   : > { %v6811_v5 = vpop.f32.mrb[19].mxu0  ;;  %6827 = vmatmul.mubr.msk.f32.vlgmr.msra.gmra.mrb[18].mxu1 %vm913_vm1, %v1542_v61 }
 0x169   : > { %6829 = vmatprep.mubr.msk.f32.mxu1 %vm7531_vm0, %v7532_v1  ;;  %7257 = vmatpush3.bf16.msra.mxu1 %v7862_v14  ;;  %v1886_v14 = vld [vmem:[%s8449_s16 + $0x18] sm:$0xff] }
 0x16a   : > { %7258 = vmatprep.subr.bf16.mxu1 %v7530_v0  ;;  %v7273_v16 = vpack.c.bf16 %v1886_v14, %v1885_v13 }
 0x16b   : > { %v1547_v10 = vpop.f32.mrb[20].mxu0 }
 0x16c   : > { %v6814_v11 = vpop.f32.mrb[21].mxu0  ;;  %6830 = vmatmul.mubr.msk.f32.gmra.mrb[20].mxu1 %vm913_vm1, %v1547_v10 }
 0x16d   : > { %6832 = vmatprep.mubr.msk.f32.mxu1 %vm7531_vm0, %v7532_v1  ;;  %7260 = vmatpush3.bf16.msra.mxu1 %v7882_v19 }
 0x16e   : > { %7270 = vmatprep.subr.bf16.mxu1 %v7269_v7 }
 0x16f   : > { %v1552_v12 = vpop.f32.mrb[22].mxu0 }
 0x170   : > { %v6817_v15 = vpop.f32.mrb[23].mxu0  ;;  %6833 = vmatmul.mubr.msk.f32.gmra.mrb[22].mxu1 %vm913_vm1, %v1552_v12 }
 0x171   : > { %6860 = vmatprep.mubr.msk.f32.mxu1 %vm7531_vm0, %v7532_v1 }
 0x173   : > { %v1718_v20 = vpop.f32.mrb[24].mxu0 }
 0x174   : > { %v6845_v21 = vpop.f32.mrb[25].mxu0  ;;  %6861 = vmatmul.mubr.msk.f32.vlgmr.msra.gmra.mrb[24].mxu1 %vm913_vm1, %v1718_v20 }
 0x175   : > { %6863 = vmatprep.mubr.msk.f32.mxu1 %vm7531_vm0, %v7532_v1  ;;  %7272 = vmatpush3.bf16.msra.mxu1 %v7269_v7 }
 0x176   : > { %7274 = vmatprep.subr.bf16.mxu1 %v7273_v16 }
 0x177   : > { %v1723_v19 = vpop.f32.mrb[26].mxu0 }
 0x178   : > { %v6848_v22 = vpop.f32.mrb[27].mxu0  ;;  %6864 = vmatmul.mubr.msk.f32.gmra.mrb[26].mxu1 %vm913_vm1, %v1723_v19 }
 0x179   : > { %6866 = vmatprep.mubr.msk.f32.mxu1 %vm7531_vm0, %v7532_v1  ;;  %7276 = vmatpush3.bf16.msra.mxu1 %v7273_v16 }
 0x17a   : > { %7286 = vmatprep.subr.bf16.mxu1 %v7269_v7 }
 0x17b   : > { %v1728_v23 = vpop.f32.mrb[28].mxu0 }
 0x17c   : > { %v6851_v24 = vpop.f32.mrb[29].mxu0  ;;  %6867 = vmatmul.mubr.msk.f32.gmra.mrb[28].mxu1 %vm913_vm1, %v1728_v23 }
 0x17f   : > { %v6879_v25 = vpop.f32.mrb[30].mxu0 }
 0x180   : > { %v1959_v26 = vpop.f32.mrb[31].mxu0 }
 0x181   : > { %6888 = vmatprep.mubr.msk.f32.mxu1 %vm913_vm1, %v1959_v26 }
 0x182   : > { %6889 = vmatmul.mubr.msk.f32.vlgmr.msra.gmra.mrb[30].mxu1 %vm913_vm1, %v6879_v25 }
 0x183   : > { %7288 = vmatpush3.bf16.msra.mxu1 %v7269_v7 }
 0x184   : > { %7290 = vmatprep.subr.bf16.mxu1 %v7273_v16 }
 0x187   : > { %v6901_v27 = vpop.f32.mrb[32].mxu0  ;;  %7292 = vmatpush3.bf16.msra.mxu1 %v7273_v16 }
 0x188   : > { %v2115_v28 = vpop.f32.mrb[33].mxu0  ;;  %7296 = vmatprep.subr.bf16.mxu1 %v7530_v0 }
 0x189   : > { %6910 = vmatprep.mubr.msk.f32.mxu1 %vm913_vm1, %v2115_v28 }
 0x18a   : > { %6911 = vmatmul.mubr.msk.f32.vlgmr.msra.gmra.mrb[32].mxu1 %vm913_vm1, %v6901_v27 }
 0x18b   : > { %6924 = vmatprep.mubr.msk.f32.mxu1 %vm7531_vm0, %v7532_v1 }
 0x217   : > { %v1104_v4 = vpop.f32.mrb[0].mxu1 }
 0x218   : > { %v6726_v17 = vpop.f32.mrb[1].mxu1  ;;  %v1287_v43 = vmul.f32 %v1104_v4, %v1104_v4 }
 0x21b   : > { %v1109_v40 = vpop.f32.mrb[2].mxu1 }
 0x21c   : > { %v6729_v41 = vpop.f32.mrb[3].mxu1  ;;  %v1288_v49 = vmul.f32 %v1109_v40, %v1109_v40 }
 0x21f   : > { %v1114_v42 = vpop.f32.mrb[4].mxu1 }
 0x220   : > { %v6732_v6 = vpop.f32.mrb[5].mxu1  ;;  %v1289_v56 = vmul.f32 %v1114_v42, %v1114_v42 }
 0x223   : > { %v1273_v18 = vpop.f32.mrb[6].mxu1 }
 0x224   : > { %v1290_v44 = vmul.f32 %v1273_v18, %v1273_v18  ;;  %v8095_v45 = vmul.f32 %v1273_v18, %v1104_v4  ;;  %v6760_v46 = vpop.f32.mrb[7].mxu1 }
 0x226   : > { %v1848_v47 = vadd.f32 %v1290_v44, %v1287_v43  ;;  %v1842_v62 = vmul.f32 2.0, %v8095_v45 }
 0x227   : > { %v1278_v48 = vpop.f32.mrb[8].mxu1 }
 0x228   : > { %v1851_v50 = vadd.f32 0.0001, %v1848_v47  ;;  %v1291_v51 = vmul.f32 %v1278_v48, %v1278_v48  ;;  %v8097_v52 = vmul.f32 %v1278_v48, %v1109_v40  ;;  %v6763_v53 = vpop.f32.mrb[9].mxu1  ;;  %v1845_v11 = vadd.f32 0.0001, %v1842_v62 }
 0x22a   : > { %7398 = vrcp.f32 %v1851_v50  ;;  %v1849_v54 = vadd.f32 %v1291_v51, %v1288_v49  ;;  %v1843_v12 = vmul.f32 2.0, %v8097_v52 }
 0x22b   : > { %v1283_v55 = vpop.f32.mrb[10].mxu1 }
 0x22c   : > { %v1852_v57 = vadd.f32 0.0001, %v1849_v54  ;;  %v1292_v58 = vmul.f32 %v1283_v55, %v1283_v55  ;;  %v8099_v59 = vmul.f32 %v1283_v55, %v1114_v42  ;;  %v6766_v60 = vpop.f32.mrb[11].mxu1  ;;  %v1846_v21 = vadd.f32 0.0001, %v1843_v12 }
 0x22e   : > { %7400 = vrcp.f32 %v1852_v57  ;;  %v1850_v61 = vadd.f32 %v1292_v58, %v1289_v56  ;;  %v1844_v19 = vmul.f32 2.0, %v8099_v59 }
 0x22f   : > { %v1455_v63 = vpop.f32.mrb[12].mxu1 }
 0x230   : > { %v1853_v5 = vadd.f32 0.0001, %v1850_v61  ;;  %v1469_v7 = vsub.f32 %v1455_v63, %v1287_v43  ;;  %v6794_v10 = vpop.f32.mrb[13].mxu1  ;;  %v1847_v27 = vadd.f32 0.0001, %v1844_v19 }
 0x232   : > { %7402 = vrcp.f32 %v1853_v5 }
 0x233   : > { %v1460_v13 = vpop.f32.mrb[14].mxu1 }
 0x234   : > { %v7399_v14 = vpop.eup %7398  ;;  %v1470_v15 = vsub.f32 %v1460_v13, %v1288_v49  ;;  %v6797_v16 = vpop.f32.mrb[15].mxu1 }
 0x235   : > { %v1855_v20 = vmul.f32 %v7399_v14, %v1845_v11 }
 0x237   : > { %v1465_v22 = vpop.f32.mrb[16].mxu1 }
 0x238   : > { %v7401_v23 = vpop.eup %7400  ;;  %v1471_v24 = vsub.f32 %v1465_v22, %v1289_v56  ;;  %v6800_v25 = vpop.f32.mrb[17].mxu1 }
 0x239   : > { %v1857_v26 = vmul.f32 %v7401_v23, %v1846_v21 }
 0x23b   : > { %v1631_v28 = vpop.f32.mrb[18].mxu1 }
 0x23c   : > { %v7403_v29 = vpop.eup %7402  ;;  %v1645_v30 = vsub.f32 %v1631_v28, %v1290_v44  ;;  %v6828_v31 = vpop.f32.mrb[19].mxu1 }
 0x23d   : > { %v1859_v32 = vmul.f32 %v7403_v29, %v1847_v27  ;;  %v922_v28 = vpop.xlane.xlu0 %921 }
 0x23e   : > { %v1830_v33 = vadd.f32 %v1645_v30, %v1469_v7  ;;  %v923_v29 = vrot.slane %v922_v28, 4 }
 0x23f   : > { %v1636_v34 = vpop.f32.mrb[20].mxu1 }
 0x240   : > { %v1833_v35 = vadd.f32 0.0009, %v1830_v33  ;;  %v1646_v36 = vsub.f32 %v1636_v34, %v1291_v51  ;;  %v6831_v37 = vpop.f32.mrb[21].mxu1  ;;  %v924_v30 = vadd.f32 %v923_v29, %v922_v28 }
 0x241   : > { %v2206_v37 = vld [vmem:[%s8505_s23] sm:$0xff] }
 0x242   : > { %7404 = vrcp.f32 %v1833_v35  ;;  %v1831_v38 = vadd.f32 %v1646_v36, %v1470_v15  ;;  %v925_v31 = vrot.slane %v924_v30, 2 }
 0x243   : > { %v1641_v39 = vpop.f32.mrb[22].mxu1 }
 0x244   : > { %v1834_v2 = vadd.f32 0.0009, %v1831_v38  ;;  %v1647_v8 = vsub.f32 %v1641_v39, %v1292_v58  ;;  %v6834_v3 = vpop.f32.mrb[23].mxu1  ;;  %v926_v33 = vadd.f32 %v925_v31, %v924_v30  ;;  %v2207_v38 = vld [vmem:[%s8505_s23 + $0x8] sm:$0xff] }
 0x245   : > { %v7297_v39 = vpack.c.bf16 %v2207_v38, %v2206_v37 }
 0x246   : > { %7406 = vrcp.f32 %v1834_v2  ;;  %v1832_v9 = vadd.f32 %v1647_v8, %v1471_v24  ;;  %v927_v34 = vrot.slane %v926_v33, 1 }
 0x247   : > { %v1807_v4 = vpop.f32.mrb[24].mxu1  ;;  %7298 = vmatpush3.bf16.msra.mxu1 %v7297_v39 }
 0x248   : > { %v1835_v17 = vadd.f32 0.0009, %v1832_v9  ;;  %v1821_v40 = vsub.f32 %v1807_v4, %v8095_v45  ;;  %v6862_v41 = vpop.f32.mrb[25].mxu1  ;;  %v928_v35 = vadd.f32 %v927_v34, %v926_v33  ;;  %7302 = vmatprep.subr.bf16.mxu1 %v7530_v0 }
 0x24a   : > { %7408 = vrcp.f32 %v1835_v17  ;;  %v1824_v42 = vmul.f32 2.0, %v1821_v40  ;;  %7335 = vpush %v928_v35 }
 0x24b   : > { %v1812_v6 = vpop.f32.mrb[26].mxu1 }
 0x24c   : > { %v7405_v18 = vpop.eup %7404  ;;  %v1827_v43 = vadd.f32 0.0009, %v1824_v42  ;;  %v1822_v44 = vsub.f32 %v1812_v6, %v8097_v52  ;;  %v6865_v46 = vpop.f32.mrb[27].mxu1 }
 0x24e   : > { %v1837_v47 = vmul.f32 %v7405_v18, %v1827_v43  ;;  %v1825_v48 = vmul.f32 2.0, %v1822_v44 }
 0x24f   : > { %v1817_v49 = vpop.f32.mrb[28].mxu1 }
 0x250   : > { %v7407_v50 = vpop.eup %7406  ;;  %v1860_v51 = vmul.f32 %v1855_v20, %v1837_v47  ;;  %v1828_v53 = vadd.f32 0.0009, %v1825_v48  ;;  %v1823_v54 = vsub.f32 %v1817_v49, %v8099_v59  ;;  %v6868_v55 = vpop.f32.mrb[29].mxu1  ;;  %v2205_v59 = vld [vmem:[%s8504_s7] sm:$0x3f]  ;;  %v2967_v48 = vld [vmem:[%s8450_s17 + $0x8] sm:$0xff] }
 0x251   : > { %v2966_v47 = vld [vmem:[%s8450_s17] sm:$0xff] }
 0x252   : > { %v1839_v56 = vmul.f32 %v7407_v50, %v1828_v53  ;;  %v1826_v45 = vmul.f32 2.0, %v1823_v54  ;;  %v1864_v5 = vsel %vm1863_vm2, %v1860_v51, 0.0  ;;  %v7327_v51 = vpack.c.bf16 %v2967_v48, %v2966_v47 }
 0x254   : > { %v7409_v57 = vpop.eup %7408  ;;  %v1861_v58 = vmul.f32 %v1857_v26, %v1839_v56  ;;  %v1829_v60 = vadd.f32 0.0009, %v1826_v45 }
 0x255   : > { %v6890_v61 = vpop.f32.mrb[30].mxu1 }
 0x256   : > { %v1841_v62 = vmul.f32 %v7409_v57, %v1829_v60  ;;  %v2502_v63 = vmul.f32 %v6890_v61, %v6890_v61  ;;  %v2040_v52 = vpop.f32.mrb[31].mxu1  ;;  %v1865_v7 = vsel %vm1863_vm2, %v1861_v58, 0.0 }
 0x257   : > { %v7294_v10 = vpack.c.bf16 %v6890_v61, %v2040_v52  ;;  %v2501_v11 = vmul.f32 %v2040_v52, %v2040_v52  ;;  %v1866_v12 = vadd.f32 %v1865_v7, %v1864_v5 }
 0x258   : > { %v1862_v13 = vmul.f32 %v1859_v32, %v1841_v62  ;;  %v2965_v32 = vld [vmem:[%s8446_s13] sm:$0xff] }
 0x259   : > { %v7306_v14 = vpack.c.bf16 %v2502_v63, %v2501_v11  ;;  %7295 = vmatpush3.bf16.msra.mxu0 %v7294_v10 }
 0x25a   : > { %v1868_v15 = vsel %vm1867_vm3, %v1862_v13, 0.0  ;;  %7299 = vmatprep.subr.bf16.mxu0 %v7530_v0 }
 0x25b   : > { %v1869_v16 = vadd.f32 %v1868_v15, %v1866_v12 }
 0x25c   : > { %6918 = vmatmul.mubr.msk.f32.vlgmr.msra.gmra.mrb[34].mxu0 %vm2208_vm4, %v2205_v59 }
 0x25d   : > { %v6912_v20 = vpop.f32.mrb[32].mxu1  ;;  %1870 = vadd.xlane.f32.xlu0 %v1869_v16  ;;  %6931 = vmatprep.mubr.msk.f32.mxu0 %vm7531_vm0, %v7532_v1 }
 0x25e   : > { %v2648_v21 = vmul.f32 %v6912_v20, %v6912_v20  ;;  %v2794_v19 = vmul.f32 %v6912_v20, %v6890_v61  ;;  %v2196_v22 = vpop.f32.mrb[33].mxu1 }
 0x25f   : > { %v7300_v23 = vpack.c.bf16 %v6912_v20, %v2196_v22  ;;  %v2647_v24 = vmul.f32 %v2196_v22, %v2196_v22  ;;  %v2793_v25 = vmul.f32 %v2196_v22, %v2040_v52 }
 0x261   : > { %v7312_v26 = vpack.c.bf16 %v2648_v21, %v2647_v24  ;;  %v7318_v27 = vpack.c.bf16 %v2794_v19, %v2793_v25  ;;  %7301 = vmatpush3.bf16.msra.mxu0 %v7300_v23 }
 0x262   : > { %7305 = vmatprep.subr.bf16.mxu0 %v7530_v0 }
 0x264   : > { %6932 = vmatmul.mubr.msk.f32.vlgmr.msra.gmra.mrb[36].mxu0 %vm2208_vm4, %v2205_v59 }
 0x265   : > { %7307 = vmatpush3.bf16.msra.mxu0 %v7306_v14  ;;  %6945 = vmatprep.mubr.msk.f32.mxu0 %vm7531_vm0, %v7532_v1 }
 0x266   : > { %7311 = vmatprep.subr.bf16.mxu0 %v7530_v0 }
 0x268   : > { %6946 = vmatmul.mubr.msk.f32.vlgmr.msra.gmra.mrb[38].mxu0 %vm2208_vm4, %v2205_v59 }
 0x269   : > { %7313 = vmatpush3.bf16.msra.mxu0 %v7312_v26  ;;  %6959 = vmatprep.mubr.msk.f32.mxu0 %vm7531_vm0, %v7532_v1 }
 0x26a   : > { %7317 = vmatprep.subr.bf16.mxu0 %v7530_v0 }
 0x26c   : > { %6960 = vmatmul.mubr.msk.f32.vlgmr.msra.gmra.mrb[40].mxu0 %vm2208_vm4, %v2205_v59 }
 0x26d   : > { %7319 = vmatpush3.bf16.msra.mxu0 %v7318_v27  ;;  %6973 = vmatprep.mubr.msk.f32.mxu0 %vm7531_vm0, %v7532_v1 }
 0x26e   : > { %7323 = vmatprep.subr.bf16.mxu0 %v7530_v0 }
 0x270   : > { %6974 = vmatmul.mubr.msk.f32.vlgmr.msra.gmra.mrb[42].mxu0 %vm2208_vm4, %v2205_v59 }
 0x271   : > { %7325 = vmatpush3.bf16.msra.mxu0 %v7294_v10  ;;  %6987 = vmatprep.mubr.msk.f32.mxu0 %vm7531_vm0, %v7532_v1 }
 0x272   : > { %7329 = vmatprep.subr.bf16.mxu0 %v7530_v0 }
 0x274   : > { %6988 = vmatmul.mubr.msk.f32.vlgmr.msra.gmra.mrb[44].mxu0 %vm2208_vm4, %v2965_v32 }
 0x275   : > { %7331 = vmatpush3.bf16.msra.mxu0 %v7300_v23  ;;  %7001 = vmatprep.mubr.msk.f32.mxu0 %vm7531_vm0, %v7532_v1  ;;  %v3257_v23 = vld [vmem:[%s8506_s4] sm:$0x1]  ;;  %s8508_s4 = sld [smem:[#allocation16_spill]] }
 0x276   : > { %7011 = vmatprep.subr.mxu0 %v7532_v1 }
 0x278   : > { %7002 = vmatmul.mubr.msk.f32.vlgmr.msra.gmra.mrb[46].mxu0 %vm2208_vm4, %v2965_v32 }
 0x279   : > { %7013 = vmatprep.mubr.msk.f32.mxu0 %vm7531_vm0, %v7532_v1 }
 0x27b   : > { %s7336_s6 = spop %7335 }
 0x27c   : > { %v930_v36 = vstv %s7336_s6 }
 0x27d   : > { %932 = vst.msk [vmem:[%s896_s10] sm:$0x1] %vm931_vm5, %v930_v36  ;;  %s8510_s10 = sld [smem:[#allocation23_spill]] }
 0x2ea   : > { %v1871_v2 = vpop.xlane.xlu0 %1870 }
 0x2eb   : > { %v1872_v8 = vrot.slane %v1871_v2, 4 }
 0x2ed   : > { %v1873_v3 = vadd.f32 %v1872_v8, %v1871_v2  ;;  %v4004_v2 = vld [vmem:[%s8447_s14] sm:$0xf] }
 0x2ee   : > { %v3258_v8 = vld [vmem:[%s8507_s1] sm:$0xff]  ;;  %s884_s1 = scalar_lea.vmem %s8455_s22, %s8522_s8 }
 0x2ef   : > { %v1874_v9 = vrot.slane %v1873_v3, 2 }
 0x2f1   : > { %v1875_v4 = vadd.f32 %v1874_v9, %v1873_v3 }
 0x2f3   : > { %v1876_v17 = vrot.slane %v1875_v4, 1 }
 0x2f5   : > { %v1877_v40 = vadd.f32 %v1876_v17, %v1875_v4 }
 0x2f7   : > { %7337 = vpush %v1877_v40 }
 0x328   : > { %s7338_s7 = spop %7337 }
 0x329   : > { %v1879_v41 = vstv %s7338_s7 }
 0x32a   : > { %1880 = vst.msk [vmem:[%s878_s9] sm:$0x1] %vm931_vm5, %v1879_v41 }
 0x32f   : > { %v2278_v42 = vpop.f32.mrb[34].mxu0 }
 0x330   : > { %v6919_v6 = vpop.f32.mrb[35].mxu0  ;;  %6925 = vmatmul.mubr.msk.f32.vlgmr.msra.gmra.mrb[34].mxu1 %vm2208_vm4, %v2278_v42 }
 0x331   : > { %7304 = vmatpush3.bf16.msra.mxu1 %v7297_v39  ;;  %6938 = vmatprep.mubr.msk.f32.mxu1 %vm7531_vm0, %v7532_v1 }
 0x332   : > { %7308 = vmatprep.subr.bf16.mxu1 %v7530_v0 }
 0x337   : > { %v2421_v18 = vpop.f32.mrb[36].mxu0 }
 0x338   : > { %v6933_v43 = vpop.f32.mrb[37].mxu0  ;;  %6939 = vmatmul.mubr.msk.f32.vlgmr.msra.gmra.mrb[36].mxu1 %vm2208_vm4, %v2421_v18 }
 0x339   : > { %7310 = vmatpush3.bf16.msra.mxu1 %v7297_v39  ;;  %6952 = vmatprep.mubr.msk.f32.mxu1 %vm7531_vm0, %v7532_v1 }
 0x33a   : > { %7314 = vmatprep.subr.bf16.mxu1 %v7530_v0 }
 0x33b   : > { %v2569_v44 = vpop.f32.mrb[38].mxu0 }
 0x33c   : > { %v6947_v46 = vpop.f32.mrb[39].mxu0  ;;  %6953 = vmatmul.mubr.msk.f32.vlgmr.msra.gmra.mrb[38].mxu1 %vm2208_vm4, %v2569_v44 }
 0x33d   : > { %7316 = vmatpush3.bf16.msra.mxu1 %v7297_v39  ;;  %6966 = vmatprep.mubr.msk.f32.mxu1 %vm7531_vm0, %v7532_v1 }
 0x33e   : > { %7320 = vmatprep.subr.bf16.mxu1 %v7530_v0 }
 0x33f   : > { %v2715_v49 = vpop.f32.mrb[40].mxu0 }
 0x340   : > { %v6961_v50 = vpop.f32.mrb[41].mxu0  ;;  %6967 = vmatmul.mubr.msk.f32.vlgmr.msra.gmra.mrb[40].mxu1 %vm2208_vm4, %v2715_v49 }
 0x341   : > { %7322 = vmatpush3.bf16.msra.mxu1 %v7297_v39  ;;  %6980 = vmatprep.mubr.msk.f32.mxu1 %vm7531_vm0, %v7532_v1 }
 0x342   : > { %7326 = vmatprep.subr.bf16.mxu1 %v7530_v0 }
 0x343   : > { %v2861_v53 = vpop.f32.mrb[42].mxu0 }
 0x344   : > { %v6975_v54 = vpop.f32.mrb[43].mxu0  ;;  %6981 = vmatmul.mubr.msk.f32.vlgmr.msra.gmra.mrb[42].mxu1 %vm2208_vm4, %v2861_v53 }
 0x345   : > { %7328 = vmatpush3.bf16.msra.mxu1 %v7327_v51  ;;  %6994 = vmatprep.mubr.msk.f32.mxu1 %vm7531_vm0, %v7532_v1 }
 0x346   : > { %7332 = vmatprep.subr.bf16.mxu1 %v7530_v0 }
 0x347   : > { %v3037_v55 = vpop.f32.mrb[44].mxu0 }
 0x348   : > { %v6989_v56 = vpop.f32.mrb[45].mxu0  ;;  %6995 = vmatmul.mubr.msk.f32.vlgmr.msra.gmra.mrb[44].mxu1 %vm2208_vm4, %v3037_v55 }
 0x349   : > { %7334 = vmatpush3.bf16.msra.mxu1 %v7327_v51  ;;  %7008 = vmatprep.mubr.msk.f32.mxu1 %vm7531_vm0, %v7532_v1  ;;  %v4005_v51 = vld [vmem:[%s8451_s18] sm:$0xff] }
 0x34a   : > { %7016 = vmatprep.subr.mxu1 %v7532_v1 }
 0x34b   : > { %v3180_v45 = vpop.f32.mrb[46].mxu0 }
 0x34c   : > { %v7003_v57 = vpop.f32.mrb[47].mxu0  ;;  %7009 = vmatmul.mubr.msk.f32.vlgmr.msra.gmra.mrb[46].mxu1 %vm2208_vm4, %v3180_v45 }
 0x34d   : > { %7018 = vmatprep.mubr.msk.f32.mxu1 %vm7531_vm0, %v7532_v1  ;;  %7017 = vmatpush3.msra.mxu1 %v3258_v8 }
 0x34e   : > { %7026 = vmatprep.subr.mxu1 %v7532_v1 }
 0x403   : > { %v2351_v58 = vpop.f32.mrb[34].mxu1 }
 0x404   : > { %v6926_v60 = vpop.f32.mrb[35].mxu1  ;;  %v2498_v61 = vmul.f32 %v2351_v58, %v2351_v58 }
 0x40b   : > { %v2494_v0 = vpop.f32.mrb[36].mxu1 }
 0x40c   : > { %v2499_v62 = vmul.f32 %v2494_v0, %v2494_v0  ;;  %v2500_v63 = vmul.f32 %v2494_v0, %v2351_v58  ;;  %v6940_v52 = vpop.f32.mrb[37].mxu1 }
 0x40e   : > { %v2947_v5 = vadd.f32 %v2499_v62, %v2498_v61  ;;  %v2945_v16 = vmul.f32 2.0, %v2500_v63 }
 0x40f   : > { %v2642_v7 = vpop.f32.mrb[38].mxu1 }
 0x410   : > { %v2948_v10 = vadd.f32 0.0001, %v2947_v5  ;;  %v2646_v11 = vsub.f32 %v2642_v7, %v2498_v61  ;;  %v6954_v12 = vpop.f32.mrb[39].mxu1  ;;  %v2946_v24 = vadd.f32 0.0001, %v2945_v16 }
 0x412   : > { %7410 = vrcp.f32 %v2948_v10 }
 0x413   : > { %v2788_v13 = vpop.f32.mrb[40].mxu1 }
 0x414   : > { %v2792_v14 = vsub.f32 %v2788_v13, %v2499_v62  ;;  %v6968_v59 = vpop.f32.mrb[41].mxu1 }
 0x416   : > { %v2941_v15 = vadd.f32 %v2792_v14, %v2646_v11 }
 0x417   : > { %v2934_v20 = vpop.f32.mrb[42].mxu1 }
 0x418   : > { %v2942_v21 = vadd.f32 0.0009, %v2941_v15  ;;  %v2938_v19 = vsub.f32 %v2934_v20, %v2500_v63  ;;  %v6982_v22 = vpop.f32.mrb[43].mxu1 }
 0x41a   : > { %7412 = vrcp.f32 %v2942_v21  ;;  %v2939_v29 = vmul.f32 2.0, %v2938_v19 }
 0x41b   : > { %v3110_v25 = vpop.f32.mrb[44].mxu1 }
 0x41c   : > { %v7411_v26 = vpop.eup %7410  ;;  %v6996_v27 = vpop.f32.mrb[45].mxu1  ;;  %7012 = vmatpush3.msra.mxu0 %v3110_v25  ;;  %v3552_v31 = vmul.f32 %v3110_v25, %v3110_v25  ;;  %v2940_v34 = vadd.f32 0.0009, %v2939_v29 }
 0x41d   : > { %7014 = vmatmul.mubr.msk.f32.vlgmr.msra.gmra.mrb[48].mxu0 %vm3259_vm6, %v3257_v23  ;;  %7021 = vmatprep.subr.mxu0 %v7532_v1  ;;  %v2950_v28 = vmul.f32 %v7411_v26, %v2946_v24 }
 0x41e   : > { %7023 = vmatprep.mubr.msk.f32.mxu0 %vm7531_vm0, %v7532_v1 }
 0x41f   : > { %v3253_v30 = vpop.f32.mrb[46].mxu1 }
 0x420   : > { %v3842_v32 = vmul.f32 %v3253_v30, %v3110_v25  ;;  %v7010_v33 = vpop.f32.mrb[47].mxu1  ;;  %7022 = vmatpush3.msra.mxu0 %v3253_v30  ;;  %v3697_v36 = vmul.f32 %v3253_v30, %v3253_v30 }
 0x421   : > { %7024 = vmatmul.mubr.msk.f32.vlgmr.msra.gmra.mrb[50].mxu0 %vm3259_vm6, %v3257_v23  ;;  %7031 = vmatprep.subr.mxu0 %v7532_v1 }
 0x422   : > { %7032 = vmatpush3.msra.mxu0 %v3552_v31  ;;  %7033 = vmatprep.mubr.msk.f32.mxu0 %vm7531_vm0, %v7532_v1 }
 0x423   : > { %7041 = vmatprep.subr.mxu0 %v7532_v1 }
 0x424   : > { %v7413_v35 = vpop.eup %7412 }
 0x425   : > { %v2944_v37 = vmul.f32 %v7413_v35, %v2940_v34  ;;  %7034 = vmatmul.mubr.msk.f32.vlgmr.msra.gmra.mrb[52].mxu0 %vm3259_vm6, %v3257_v23 }
 0x426   : > { %7042 = vmatpush3.msra.mxu0 %v3697_v36  ;;  %7043 = vmatprep.mubr.msk.f32.mxu0 %vm7531_vm0, %v7532_v1 }
 0x427   : > { %7051 = vmatprep.subr.mxu0 %v7532_v1  ;;  %v2951_v38 = vmul.f32 %v2950_v28, %v2944_v37 }
 0x429   : > { %7044 = vmatmul.mubr.msk.f32.vlgmr.msra.gmra.mrb[54].mxu0 %vm3259_vm6, %v3257_v23  ;;  %v2953_v39 = vsel %vm2952_vm7, %v2951_v38, 0.0 }
 0x42a   : > { %7052 = vmatpush3.msra.mxu0 %v3842_v32  ;;  %2954 = vadd.xlane.f32.xlu1 %v2953_v39  ;;  %v5061_v39 = vld [vmem:[%s8448_s15] sm:$0x3] }
 0x42b   : > { %7053 = vmatprep.mubr.msk.f32.mxu0 %vm7531_vm0, %v7532_v1  ;;  %7061 = vmatprep.subr.mxu0 %v7532_v1 }
 0x42d   : > { %7054 = vmatmul.mubr.msk.f32.vlgmr.msra.gmra.mrb[56].mxu0 %vm3259_vm6, %v3257_v23  ;;  %v4295_v23 = vld [vmem:[%s8508_s4] sm:$0x1] }
 0x42e   : > { %7062 = vmatpush3.msra.mxu0 %v3110_v25  ;;  %7063 = vmatprep.mubr.msk.f32.mxu0 %vm7531_vm0, %v7532_v1 }
 0x42f   : > { %7071 = vmatprep.subr.mxu0 %v7532_v1 }
 0x431   : > { %7064 = vmatmul.mubr.msk.f32.vlgmr.msra.gmra.mrb[58].mxu0 %vm3259_vm6, %v4004_v2 }
 0x432   : > { %7072 = vmatpush3.msra.mxu0 %v3253_v30  ;;  %7073 = vmatprep.mubr.msk.f32.mxu0 %vm7531_vm0, %v7532_v1 }
 0x433   : > { %7081 = vmatprep.subr.mxu0 %v7532_v1 }
 0x435   : > { %7074 = vmatmul.mubr.msk.f32.vlgmr.msra.gmra.mrb[60].mxu0 %vm3259_vm6, %v4004_v2 }
 0x436   : > { %7083 = vmatprep.mubr.msk.f32.mxu0 %vm7531_vm0, %v7532_v1 }
 0x4b7   : > { %v2955_v3 = vpop.xlane.xlu1 %2954 }
 0x4b8   : > { %v2956_v9 = vrot.slane %v2955_v3, 4 }
 0x4ba   : > { %v2957_v4 = vadd.f32 %v2956_v9, %v2955_v3 }
 0x4bc   : > { %v2958_v17 = vrot.slane %v2957_v4, 2 }
 0x4be   : > { %v2959_v40 = vadd.f32 %v2958_v17, %v2957_v4 }
 0x4c0   : > { %v2960_v41 = vrot.slane %v2959_v40, 1 }
 0x4c2   : > { %v2961_v42 = vadd.f32 %v2960_v41, %v2959_v40 }
 0x4c4   : > { %7339 = vpush %v2961_v42 }
 0x4f0   : > { %v3329_v6 = vpop.f32.mrb[48].mxu0 }
 0x4f1   : > { %v7015_v18 = vpop.f32.mrb[49].mxu0  ;;  %7019 = vmatmul.mubr.msk.f32.vlgmr.msra.gmra.mrb[48].mxu1 %vm3259_vm6, %v3329_v6 }
 0x4f2   : > { %7027 = vmatpush3.msra.mxu1 %v3258_v8  ;;  %7028 = vmatprep.mubr.msk.f32.mxu1 %vm7531_vm0, %v7532_v1  ;;  %v5062_v18 = vld [vmem:[%s8510_s10] sm:$0xf]  ;;  %s8514_s10 = sld [smem:[#allocation25_spill]] }
 0x4f3   : > { %7036 = vmatprep.subr.mxu1 %v7532_v1 }
 0x4f4   : > { %v3472_v43 = vpop.f32.mrb[50].mxu0 }
 0x4f5   : > { %s7340_s19 = spop %7339  ;;  %v7025_v44 = vpop.f32.mrb[51].mxu0  ;;  %7029 = vmatmul.mubr.msk.f32.vlgmr.msra.gmra.mrb[50].mxu1 %vm3259_vm6, %v3472_v43 }
 0x4f6   : > { %v2963_v46 = vstv %s7340_s19  ;;  %7037 = vmatpush3.msra.mxu1 %v3258_v8  ;;  %7038 = vmatprep.mubr.msk.f32.mxu1 %vm7531_vm0, %v7532_v1  ;;  %s8509_s19 = sld [smem:[#allocation21_spill]] }
 0x4f7   : > { %2964 = vst.msk [vmem:[%s881_s2] sm:$0x1] %vm931_vm5, %v2963_v46  ;;  %7046 = vmatprep.subr.mxu1 %v7532_v1 }
 0x4f8   : > { %v3619_v47 = vpop.f32.mrb[52].mxu0  ;;  %s890_s6 = scalar_lea.vmem %s8514_s10, %s8522_s8 }
 0x4f9   : > { %v7035_v48 = vpop.f32.mrb[53].mxu0  ;;  %7039 = vmatmul.mubr.msk.f32.vlgmr.msra.gmra.mrb[52].mxu1 %vm3259_vm6, %v3619_v47 }
 0x4fa   : > { %7047 = vmatpush3.msra.mxu1 %v3258_v8  ;;  %7048 = vmatprep.mubr.msk.f32.mxu1 %vm7531_vm0, %v7532_v1 }
 0x4fb   : > { %7056 = vmatprep.subr.mxu1 %v7532_v1 }
 0x4fc   : > { %v3764_v49 = vpop.f32.mrb[54].mxu0 }
 0x4fd   : > { %v7045_v50 = vpop.f32.mrb[55].mxu0  ;;  %7049 = vmatmul.mubr.msk.f32.vlgmr.msra.gmra.mrb[54].mxu1 %vm3259_vm6, %v3764_v49 }
 0x4fe   : > { %7057 = vmatpush3.msra.mxu1 %v3258_v8  ;;  %7058 = vmatprep.mubr.msk.f32.mxu1 %vm7531_vm0, %v7532_v1  ;;  %v4296_v8 = vld [vmem:[%s8509_s19] sm:$0xf]  ;;  %s8513_s19 = sld [smem:[#allocation22_spill]] }
 0x4ff   : > { %7066 = vmatprep.subr.mxu1 %v7532_v1 }
 0x500   : > { %v3909_v53 = vpop.f32.mrb[56].mxu0 }
 0x501   : > { %v7055_v54 = vpop.f32.mrb[57].mxu0  ;;  %7059 = vmatmul.mubr.msk.f32.vlgmr.msra.gmra.mrb[56].mxu1 %vm3259_vm6, %v3909_v53 }
 0x502   : > { %7067 = vmatpush3.msra.mxu1 %v4005_v51  ;;  %7068 = vmatprep.mubr.msk.f32.mxu1 %vm7531_vm0, %v7532_v1 }
 0x503   : > { %7076 = vmatprep.subr.mxu1 %v7532_v1 }
 0x504   : > { %v4075_v55 = vpop.f32.mrb[58].mxu0 }
 0x505   : > { %v7065_v56 = vpop.f32.mrb[59].mxu0  ;;  %7069 = vmatmul.mubr.msk.f32.vlgmr.msra.gmra.mrb[58].mxu1 %vm3259_vm6, %v4075_v55 }
 0x506   : > { %7077 = vmatpush3.msra.mxu1 %v4005_v51  ;;  %7078 = vmatprep.mubr.msk.f32.mxu1 %vm7531_vm0, %v7532_v1 }
 0x507   : > { %7086 = vmatprep.subr.mxu1 %v7532_v1 }
 0x508   : > { %v4218_v45 = vpop.f32.mrb[60].mxu0 }
 0x509   : > { %v7075_v57 = vpop.f32.mrb[61].mxu0  ;;  %7079 = vmatmul.mubr.msk.f32.vlgmr.msra.gmra.mrb[60].mxu1 %vm3259_vm6, %v4218_v45 }
 0x50a   : > { %7088 = vmatprep.mubr.msk.f32.mxu1 %vm7531_vm0, %v7532_v1  ;;  %7087 = vmatpush3.msk.msra.mxu1 %vm4301_vm8, %v4296_v8 }
 0x50b   : > { %7096 = vmatprep.subr.mxu1 %v7532_v1 }
 0x5c4   : > { %v3402_v58 = vpop.f32.mrb[48].mxu1 }
 0x5c5   : > { %v7020_v60 = vpop.f32.mrb[49].mxu1  ;;  %v3549_v61 = vmul.f32 %v3402_v58, %v3402_v58 }
 0x5c8   : > { %v3545_v0 = vpop.f32.mrb[50].mxu1 }
 0x5c9   : > { %v3550_v62 = vmul.f32 %v3545_v0, %v3545_v0  ;;  %v3551_v63 = vmul.f32 %v3545_v0, %v3402_v58  ;;  %v7030_v52 = vpop.f32.mrb[51].mxu1 }
 0x5cb   : > { %v3995_v5 = vadd.f32 %v3550_v62, %v3549_v61  ;;  %v3993_v16 = vmul.f32 2.0, %v3551_v63 }
 0x5cc   : > { %v3692_v7 = vpop.f32.mrb[52].mxu1 }
 0x5cd   : > { %v3996_v10 = vadd.f32 0.0001, %v3995_v5  ;;  %v3696_v11 = vsub.f32 %v3692_v7, %v3549_v61  ;;  %v7040_v12 = vpop.f32.mrb[53].mxu1  ;;  %v3994_v24 = vadd.f32 0.0001, %v3993_v16 }
 0x5cf   : > { %7414 = vrcp.f32 %v3996_v10 }
 0x5d0   : > { %v3837_v13 = vpop.f32.mrb[54].mxu1 }
 0x5d1   : > { %v3841_v14 = vsub.f32 %v3837_v13, %v3550_v62  ;;  %v7050_v59 = vpop.f32.mrb[55].mxu1 }
 0x5d3   : > { %v3989_v15 = vadd.f32 %v3841_v14, %v3696_v11  ;;  %v5355_v14 = vld [vmem:[%s8511_s11] sm:$0x1] }
 0x5d4   : > { %v3982_v20 = vpop.f32.mrb[56].mxu1 }
 0x5d5   : > { %v3990_v21 = vadd.f32 0.0009, %v3989_v15  ;;  %v3986_v19 = vsub.f32 %v3982_v20, %v3551_v63  ;;  %v7060_v22 = vpop.f32.mrb[57].mxu1 }
 0x5d7   : > { %7416 = vrcp.f32 %v3990_v21  ;;  %v3987_v29 = vmul.f32 2.0, %v3986_v19 }
 0x5d8   : > { %v4148_v25 = vpop.f32.mrb[58].mxu1 }
 0x5d9   : > { %v7415_v26 = vpop.eup %7414  ;;  %v7070_v27 = vpop.f32.mrb[59].mxu1  ;;  %7082 = vmatpush3.msk.msra.mxu0 %vm4301_vm8, %v4148_v25  ;;  %v4600_v31 = vmul.f32 %v4148_v25, %v4148_v25  ;;  %v3988_v34 = vadd.f32 0.0009, %v3987_v29 }
 0x5da   : > { %7084 = vmatmul.mubr.msk.f32.vlgmr.msra.gmra.mrb[62].mxu0 %vm4297_vm9, %v4295_v23  ;;  %7091 = vmatprep.subr.mxu0 %v7532_v1  ;;  %v3998_v28 = vmul.f32 %v7415_v26, %v3994_v24 }
 0x5db   : > { %7093 = vmatprep.mubr.msk.f32.mxu0 %vm7531_vm0, %v7532_v1 }
 0x5dc   : > { %v4291_v30 = vpop.f32.mrb[60].mxu1 }
 0x5dd   : > { %v4896_v32 = vmul.f32 %v4291_v30, %v4148_v25  ;;  %v7080_v33 = vpop.f32.mrb[61].mxu1  ;;  %7092 = vmatpush3.msk.msra.mxu0 %vm4301_vm8, %v4291_v30  ;;  %v4748_v36 = vmul.f32 %v4291_v30, %v4291_v30 }
 0x5de   : > { %7094 = vmatmul.mubr.msk.f32.vlgmr.msra.gmra.mrb[64].mxu0 %vm4297_vm9, %v4295_v23  ;;  %7101 = vmatprep.subr.mxu0 %v7532_v1 }
 0x5df   : > { %7102 = vmatpush3.msk.msra.mxu0 %vm4301_vm8, %v4600_v31  ;;  %7103 = vmatprep.mubr.msk.f32.mxu0 %vm7531_vm0, %v7532_v1 }
 0x5e0   : > { %7111 = vmatprep.subr.mxu0 %v7532_v1 }
 0x5e1   : > { %v7417_v35 = vpop.eup %7416 }
 0x5e2   : > { %7104 = vmatmul.mubr.msk.f32.vlgmr.msra.gmra.mrb[66].mxu0 %vm4297_vm9, %v4295_v23  ;;  %v3992_v37 = vmul.f32 %v7417_v35, %v3988_v34 }
 0x5e3   : > { %7112 = vmatpush3.msk.msra.mxu0 %vm4301_vm8, %v4748_v36  ;;  %7113 = vmatprep.mubr.msk.f32.mxu0 %vm7531_vm0, %v7532_v1 }
 0x5e4   : > { %7121 = vmatprep.subr.mxu0 %v7532_v1  ;;  %v3999_v38 = vmul.f32 %v3998_v28, %v3992_v37 }
 0x5e6   : > { %7341 = vpush %v3999_v38  ;;  %7114 = vmatmul.mubr.msk.f32.vlgmr.msra.gmra.mrb[68].mxu0 %vm4297_vm9, %v4295_v23 }
 0x5e7   : > { %7122 = vmatpush3.msk.msra.mxu0 %vm4301_vm8, %v4896_v32  ;;  %7123 = vmatprep.mubr.msk.f32.mxu0 %vm7531_vm0, %v7532_v1  ;;  %v5356_v32 = vld [vmem:[%s8513_s19] sm:$0x3] }
 0x5e8   : > { %7131 = vmatprep.subr.mxu0 %v7532_v1 }
 0x5ea   : > { %7124 = vmatmul.mubr.msk.f32.vlgmr.msra.gmra.mrb[70].mxu0 %vm4297_vm9, %v4295_v23 }
 0x5eb   : > { %7132 = vmatpush3.msk.msra.mxu0 %vm4301_vm8, %v4148_v25  ;;  %7133 = vmatprep.mubr.msk.f32.mxu0 %vm7531_vm0, %v7532_v1 }
 0x5ec   : > { %7141 = vmatprep.subr.mxu0 %v7532_v1 }
 0x5ee   : > { %7134 = vmatmul.mubr.msk.f32.vlgmr.msra.gmra.mrb[72].mxu0 %vm4297_vm9, %v5061_v39 }
 0x5ef   : > { %7142 = vmatpush3.msk.msra.mxu0 %vm4301_vm8, %v4291_v30  ;;  %7143 = vmatprep.mubr.msk.f32.mxu0 %vm7531_vm0, %v7532_v1 }
 0x5f0   : > { %7151 = vmatprep.subr.mxu0 %v7532_v1 }
 0x5f2   : > { %7144 = vmatmul.mubr.msk.f32.vlgmr.msra.gmra.mrb[74].mxu0 %vm4297_vm9, %v5061_v39 }
 0x5f3   : > { %7153 = vmatprep.mubr.msk.f32.mxu0 %vm7531_vm0, %v7532_v1 }
 0x617   : > { %s7342_s9 = spop %7341 }
 0x618   : > { %v4002_v2 = vstv %s7342_s9 }
 0x619   : > { %4003 = vst.msk [vmem:[%s884_s1] sm:$0x1] %vm931_vm5, %v4002_v2  ;;  %s887_s1 = scalar_lea.vmem %s8512_s27, %s8522_s8  ;;  %s893_s27 = scalar_lea.vmem %s8515_s25, %s8522_s8 }
 0x6ad   : > { %v4371_v3 = vpop.f32.mrb[62].mxu0 }
 0x6ae   : > { %v7085_v9 = vpop.f32.mrb[63].mxu0  ;;  %7089 = vmatmul.mubr.msk.f32.vlgmr.msra.gmra.mrb[62].mxu1 %vm4297_vm9, %v4371_v3 }
 0x6af   : > { %7097 = vmatpush3.msk.msra.mxu1 %vm4301_vm8, %v4296_v8  ;;  %7098 = vmatprep.mubr.msk.f32.mxu1 %vm7531_vm0, %v7532_v1 }
 0x6b0   : > { %7106 = vmatprep.subr.mxu1 %v7532_v1 }
 0x6b1   : > { %v4520_v4 = vpop.f32.mrb[64].mxu0 }
 0x6b2   : > { %v7095_v17 = vpop.f32.mrb[65].mxu0  ;;  %7099 = vmatmul.mubr.msk.f32.vlgmr.msra.gmra.mrb[64].mxu1 %vm4297_vm9, %v4520_v4 }
 0x6b3   : > { %7107 = vmatpush3.msk.msra.mxu1 %vm4301_vm8, %v4296_v8  ;;  %7108 = vmatprep.mubr.msk.f32.mxu1 %vm7531_vm0, %v7532_v1 }
 0x6b4   : > { %7116 = vmatprep.subr.mxu1 %v7532_v1 }
 0x6b5   : > { %v4670_v40 = vpop.f32.mrb[66].mxu0 }
 0x6b6   : > { %v7105_v41 = vpop.f32.mrb[67].mxu0  ;;  %7109 = vmatmul.mubr.msk.f32.vlgmr.msra.gmra.mrb[66].mxu1 %vm4297_vm9, %v4670_v40 }
 0x6b7   : > { %7117 = vmatpush3.msk.msra.mxu1 %vm4301_vm8, %v4296_v8  ;;  %7118 = vmatprep.mubr.msk.f32.mxu1 %vm7531_vm0, %v7532_v1 }
 0x6b8   : > { %7126 = vmatprep.subr.mxu1 %v7532_v1 }
 0x6b9   : > { %v4818_v42 = vpop.f32.mrb[68].mxu0 }
 0x6ba   : > { %v7115_v6 = vpop.f32.mrb[69].mxu0  ;;  %7119 = vmatmul.mubr.msk.f32.vlgmr.msra.gmra.mrb[68].mxu1 %vm4297_vm9, %v4818_v42 }
 0x6bb   : > { %7127 = vmatpush3.msk.msra.mxu1 %vm4301_vm8, %v4296_v8  ;;  %7128 = vmatprep.mubr.msk.f32.mxu1 %vm7531_vm0, %v7532_v1 }
 0x6bc   : > { %7136 = vmatprep.subr.mxu1 %v7532_v1 }
 0x6bd   : > { %v4966_v43 = vpop.f32.mrb[70].mxu0 }
 0x6be   : > { %v7125_v44 = vpop.f32.mrb[71].mxu0  ;;  %7129 = vmatmul.mubr.msk.f32.vlgmr.msra.gmra.mrb[70].mxu1 %vm4297_vm9, %v4966_v43 }
 0x6bf   : > { %7137 = vmatpush3.msk.msra.mxu1 %vm4301_vm8, %v5062_v18  ;;  %7138 = vmatprep.mubr.msk.f32.mxu1 %vm7531_vm0, %v7532_v1 }
 0x6c0   : > { %7146 = vmatprep.subr.mxu1 %v7532_v1 }
 0x6c1   : > { %v5132_v46 = vpop.f32.mrb[72].mxu0 }
 0x6c2   : > { %v7135_v47 = vpop.f32.mrb[73].mxu0  ;;  %7139 = vmatmul.mubr.msk.f32.vlgmr.msra.gmra.mrb[72].mxu1 %vm4297_vm9, %v5132_v46 }
 0x6c3   : > { %7147 = vmatpush3.msk.msra.mxu1 %vm4301_vm8, %v5062_v18  ;;  %7148 = vmatprep.mubr.msk.f32.mxu1 %vm7531_vm0, %v7532_v1 }
 0x6c4   : > { %7156 = vmatprep.subr.mxu1 %v7532_v1 }
 0x6c5   : > { %v5278_v48 = vpop.f32.mrb[74].mxu0 }
 0x6c6   : > { %v7145_v49 = vpop.f32.mrb[75].mxu0  ;;  %7149 = vmatmul.mubr.msk.f32.vlgmr.msra.gmra.mrb[74].mxu1 %vm4297_vm9, %v5278_v48 }
 0x6c7   : > { %7158 = vmatprep.mubr.msk.f32.mxu1 %vm7531_vm0, %v7532_v1  ;;  %7157 = vmatpush3.msk.msra.mxu1 %vm5361_vm10, %v5356_v32 }
 0x6c8   : > { %7166 = vmatprep.subr.mxu1 %v7532_v1 }
 0x781   : > { %v4447_v50 = vpop.f32.mrb[62].mxu1 }
 0x782   : > { %v7090_v51 = vpop.f32.mrb[63].mxu1  ;;  %v4597_v54 = vmul.f32 %v4447_v50, %v4447_v50 }
 0x785   : > { %v4593_v53 = vpop.f32.mrb[64].mxu1 }
 0x786   : > { %v4598_v55 = vmul.f32 %v4593_v53, %v4593_v53  ;;  %v4599_v56 = vmul.f32 %v4593_v53, %v4447_v50  ;;  %v7100_v45 = vpop.f32.mrb[65].mxu1 }
 0x788   : > { %v5052_v57 = vadd.f32 %v4598_v55, %v4597_v54  ;;  %v5050_v7 = vmul.f32 2.0, %v4599_v56 }
 0x789   : > { %v4743_v58 = vpop.f32.mrb[66].mxu1 }
 0x78a   : > { %v5053_v60 = vadd.f32 0.0001, %v5052_v57  ;;  %v4747_v0 = vsub.f32 %v4743_v58, %v4597_v54  ;;  %v7110_v61 = vpop.f32.mrb[67].mxu1  ;;  %v5051_v59 = vadd.f32 0.0001, %v5050_v7 }
 0x78c   : > { %7418 = vrcp.f32 %v5053_v60 }
 0x78d   : > { %v4891_v62 = vpop.f32.mrb[68].mxu1 }
 0x78e   : > { %v4895_v63 = vsub.f32 %v4891_v62, %v4598_v55  ;;  %v7120_v52 = vpop.f32.mrb[69].mxu1 }
 0x790   : > { %v5046_v5 = vadd.f32 %v4895_v63, %v4747_v0 }
 0x791   : > { %v5039_v10 = vpop.f32.mrb[70].mxu1 }
 0x792   : > { %v5047_v11 = vadd.f32 0.0009, %v5046_v5  ;;  %v5043_v12 = vsub.f32 %v5039_v10, %v4599_v56  ;;  %v7130_v13 = vpop.f32.mrb[71].mxu1 }
 0x794   : > { %7420 = vrcp.f32 %v5047_v11  ;;  %v5044_v19 = vmul.f32 2.0, %v5043_v12 }
 0x795   : > { %v5208_v15 = vpop.f32.mrb[72].mxu1 }
 0x796   : > { %v7419_v16 = vpop.eup %7418  ;;  %v7140_v20 = vpop.f32.mrb[73].mxu1  ;;  %7152 = vmatpush3.msk.msra.mxu0 %vm5361_vm10, %v5208_v15  ;;  %v5660_v23 = vmul.f32 %v5208_v15, %v5208_v15  ;;  %v5045_v26 = vadd.f32 0.0009, %v5044_v19 }
 0x797   : > { %7154 = vmatmul.mubr.msk.f32.vlgmr.msra.gmra.mrb[76].mxu0 %vm5357_vm11, %v5355_v14  ;;  %7161 = vmatprep.subr.mxu0 %v7532_v1  ;;  %v5055_v21 = vmul.f32 %v7419_v16, %v5051_v59 }
 0x798   : > { %7163 = vmatprep.mubr.msk.f32.mxu0 %vm7531_vm0, %v7532_v1 }
 0x799   : > { %v5351_v22 = vpop.f32.mrb[74].mxu1 }
 0x79a   : > { %v5956_v24 = vmul.f32 %v5351_v22, %v5208_v15  ;;  %v7150_v25 = vpop.f32.mrb[75].mxu1  ;;  %7162 = vmatpush3.msk.msra.mxu0 %vm5361_vm10, %v5351_v22  ;;  %v5808_v28 = vmul.f32 %v5351_v22, %v5351_v22 }
 0x79b   : > { %7164 = vmatmul.mubr.msk.f32.vlgmr.msra.gmra.mrb[78].mxu0 %vm5357_vm11, %v5355_v14  ;;  %7171 = vmatprep.subr.mxu0 %v7532_v1 }
 0x79c   : > { %7172 = vmatpush3.msk.msra.mxu0 %vm5361_vm10, %v5660_v23  ;;  %7173 = vmatprep.mubr.msk.f32.mxu0 %vm7531_vm0, %v7532_v1 }
 0x79d   : > { %7181 = vmatprep.subr.mxu0 %v7532_v1 }
 0x79e   : > { %v7421_v27 = vpop.eup %7420 }
 0x79f   : > { %7174 = vmatmul.mubr.msk.f32.vlgmr.msra.gmra.mrb[80].mxu0 %vm5357_vm11, %v5355_v14  ;;  %v5049_v29 = vmul.f32 %v7421_v27, %v5045_v26 }
 0x7a0   : > { %7182 = vmatpush3.msk.msra.mxu0 %vm5361_vm10, %v5808_v28  ;;  %7183 = vmatprep.mubr.msk.f32.mxu0 %vm7531_vm0, %v7532_v1 }
 0x7a1   : > { %7191 = vmatprep.subr.mxu0 %v7532_v1  ;;  %v5056_v30 = vmul.f32 %v5055_v21, %v5049_v29 }
 0x7a3   : > { %7343 = vpush %v5056_v30  ;;  %7184 = vmatmul.mubr.msk.f32.vlgmr.msra.gmra.mrb[82].mxu0 %vm5357_vm11, %v5355_v14 }
 0x7a4   : > { %7192 = vmatpush3.msk.msra.mxu0 %vm5361_vm10, %v5956_v24  ;;  %7193 = vmatprep.mubr.msk.f32.mxu0 %vm7531_vm0, %v7532_v1 }
 0x7a7   : > { %7194 = vmatmul.mubr.msk.f32.vlgmr.msra.gmra.mrb[84].mxu0 %vm5357_vm11, %v5355_v14 }
 0x7d4   : > { %s7344_s9 = spop %7343 }
 0x7d5   : > { %v5059_v31 = vstv %s7344_s9 }
 0x7d6   : > { %5060 = vst.msk [vmem:[%s887_s1] sm:$0x1] %vm931_vm5, %v5059_v31 }
 0x86a   : > { %v5431_v33 = vpop.f32.mrb[76].mxu0 }
 0x86b   : > { %7159 = vmatmul.mubr.msk.f32.vlgmr.msra.gmra.mrb[76].mxu1 %vm5357_vm11, %v5431_v33  ;;  %v7155_v34 = vpop.f32.mrb[77].mxu0 }
 0x86c   : > { %7167 = vmatpush3.msk.msra.mxu1 %vm5361_vm10, %v5356_v32  ;;  %7168 = vmatprep.mubr.msk.f32.mxu1 %vm7531_vm0, %v7532_v1 }
 0x86d   : > { %7176 = vmatprep.subr.mxu1 %v7532_v1 }
 0x86e   : > { %v5580_v35 = vpop.f32.mrb[78].mxu0 }
 0x86f   : > { %7169 = vmatmul.mubr.msk.f32.vlgmr.msra.gmra.mrb[78].mxu1 %vm5357_vm11, %v5580_v35  ;;  %v7165_v36 = vpop.f32.mrb[79].mxu0 }
 0x870   : > { %7177 = vmatpush3.msk.msra.mxu1 %vm5361_vm10, %v5356_v32  ;;  %7178 = vmatprep.mubr.msk.f32.mxu1 %vm7531_vm0, %v7532_v1 }
 0x871   : > { %7186 = vmatprep.subr.mxu1 %v7532_v1 }
 0x872   : > { %v5730_v37 = vpop.f32.mrb[80].mxu0 }
 0x873   : > { %7179 = vmatmul.mubr.msk.f32.vlgmr.msra.gmra.mrb[80].mxu1 %vm5357_vm11, %v5730_v37  ;;  %v7175_v38 = vpop.f32.mrb[81].mxu0 }
 0x874   : > { %7187 = vmatpush3.msk.msra.mxu1 %vm5361_vm10, %v5356_v32  ;;  %7188 = vmatprep.mubr.msk.f32.mxu1 %vm7531_vm0, %v7532_v1 }
 0x875   : > { %7196 = vmatprep.subr.mxu1 %v7532_v1 }
 0x876   : > { %v5878_v39 = vpop.f32.mrb[82].mxu0 }
 0x877   : > { %7189 = vmatmul.mubr.msk.f32.vlgmr.msra.gmra.mrb[82].mxu1 %vm5357_vm11, %v5878_v39  ;;  %v7185_v2 = vpop.f32.mrb[83].mxu0 }
 0x878   : > { %7197 = vmatpush3.msk.msra.mxu1 %vm5361_vm10, %v5356_v32  ;;  %7198 = vmatprep.mubr.msk.f32.mxu1 %vm7531_vm0, %v7532_v1 }
 0x87a   : > { %v6026_v8 = vpop.f32.mrb[84].mxu0 }
 0x87b   : > { %7199 = vmatmul.mubr.msk.f32.vlgmr.msra.gmra.mrb[84].mxu1 %vm5357_vm11, %v6026_v8  ;;  %v7195_v3 = vpop.f32.mrb[85].mxu0 }
 0x93e   : > { %v5507_v9 = vpop.f32.mrb[76].mxu1 }
 0x93f   : > { %v7160_v4 = vpop.f32.mrb[77].mxu1  ;;  %v5657_v40 = vmul.f32 %v5507_v9, %v5507_v9 }
 0x942   : > { %v5653_v17 = vpop.f32.mrb[78].mxu1 }
 0x943   : > { %v5658_v41 = vmul.f32 %v5653_v17, %v5653_v17  ;;  %v5659_v42 = vmul.f32 %v5653_v17, %v5507_v9  ;;  %v7170_v6 = vpop.f32.mrb[79].mxu1 }
 0x945   : > { %v6112_v18 = vadd.f32 %v5658_v41, %v5657_v40  ;;  %v6110_v51 = vmul.f32 2.0, %v5659_v42 }
 0x946   : > { %v5803_v43 = vpop.f32.mrb[80].mxu1 }
 0x947   : > { %v6113_v44 = vadd.f32 0.0001, %v6112_v18  ;;  %v5807_v46 = vsub.f32 %v5803_v43, %v5657_v40  ;;  %v7180_v47 = vpop.f32.mrb[81].mxu1  ;;  %v6111_v45 = vadd.f32 0.0001, %v6110_v51 }
 0x949   : > { %7422 = vrcp.f32 %v6113_v44 }
 0x94a   : > { %v5951_v48 = vpop.f32.mrb[82].mxu1 }
 0x94b   : > { %v5955_v49 = vsub.f32 %v5951_v48, %v5658_v41  ;;  %v7190_v1 = vpop.f32.mrb[83].mxu1 }
 0x94d   : > { %v6106_v50 = vadd.f32 %v5955_v49, %v5807_v46 }
 0x94e   : > { %v6099_v53 = vpop.f32.mrb[84].mxu1 }
 0x94f   : > { %v6107_v54 = vadd.f32 0.0009, %v6106_v50  ;;  %v6103_v55 = vsub.f32 %v6099_v53, %v5659_v42  ;;  %v7200_v56 = vpop.f32.mrb[85].mxu1 }
 0x951   : > { %7424 = vrcp.f32 %v6107_v54  ;;  %v6104_v60 = vmul.f32 2.0, %v6103_v55 }
 0x953   : > { %v7423_v57 = vpop.eup %7422  ;;  %v6105_v0 = vadd.f32 0.0009, %v6104_v60 }
 0x954   : > { %v6115_v58 = vmul.f32 %v7423_v57, %v6111_v45 }
 0x95b   : > { %v7425_v61 = vpop.eup %7424 }
 0x95c   : > { %v6109_v62 = vmul.f32 %v7425_v61, %v6105_v0 }
 0x95e   : > { %v6116_v63 = vmul.f32 %v6115_v58, %v6109_v62 }
 0x960   : > { %7345 = vpush %v6116_v63 }
 0x961   : > { %7347 = vpush %v6109_v62 }
 0x991   : > { %s7346_s4 = spop %7345 }
 0x992   : > { %v6119_v52 = vstv %s7346_s4  ;;  %s7348_s1 = spop %7347 }
 0x993   : > { %6120 = vst.msk [vmem:[%s890_s6] sm:$0x1] %vm931_vm5, %v6119_v52  ;;  %v6123_v5 = vstv %s7348_s1 }
 0x994   : > { %6124 = vst.msk [vmem:[%s893_s27] sm:$0x1] %vm931_vm5, %v6123_v5 }
 0x995 PF: > { %s8516_s28 = sld [smem:[#allocation9_spill]]  ;;  %s8517_s9 = sld [smem:[#allocation8_spill]] }
 0x996   : > { %s8518_s7 = sld [smem:[#allocation10_spill]]  ;;  %s8519_s27 = smov %s7516_s3 }
 0x99b   : > { %p40_p11 = scmp.ge.s32.totalorder %s8516_s28, 8   ;;  %s8520_s3 = smov %s8517_s9 }
 0x99d   :  { %42 = sbr.rel (!%p40_p11) target bundleno = 22 (0x16), region = 225 }
 0x9a4   :  { %6214 = vsyncpa [#allocation3], 1 }
 0x9a5   :  { %6216 = vsyncpa [#allocation3 + $0x1], 1 }
 0x9a6   :  { %6217 = vsyncpa [#allocation5], 1 }
 0x9a7   :  { %6219 = vsyncpa [#allocation5 + $0x1], 1 }

</bundles_post_ra>
